<compile_context>
chip_gen: v5e
topology: v5e:2x2
jax: 0.10.0
libtpu: 0.0.40
codegen_flags: <defaults>
</compile_context>

<pallas_src>
import functools

import jax
import jax.numpy as jnp
from jax.experimental import pallas as pl
from jax.experimental.pallas import tpu as pltpu


def _round_up(x, m):
    return ((x + m - 1) // m) * m


def mlp_kernel(x_ref, w1_ref, b1_ref, w2_ref, b2_ref, o_ref):
    # x arrives f32 in VMEM; cast to bf16 in-kernel (hidden under the matmul).
    x = x_ref[...].astype(jnp.bfloat16)
    # Hidden layer: bf16 operands on the MXU, f32 accumulate.
    h = jnp.dot(x, w1_ref[...], preferred_element_type=jnp.float32)
    # Fused bias + ReLU + bf16 cast: h is materialized as bf16 (half the store bytes on v5e).
    h = jnp.maximum(h + b1_ref[...], 0.0).astype(jnp.bfloat16)   # b1 is (1, hidden_pad)
    # Output layer: bf16 MXU matmul, f32 accumulate, f32 bias add.
    out = jnp.dot(h, w2_ref[...], preferred_element_type=jnp.float32)
    o_ref[...] = (out + b2_ref[...]).astype(o_ref.dtype)


def prepare_params(w1, b1, w2, b2):
    """One-time parameter prep: zero-pad hidden (400->512) and out_features (->mult of 128),
    cast weights to bf16. Call ONCE, reuse the result for every forward call.

    w1: (in, 400), b1: (400,), w2: (400, out), b2: (out,)  -- weights stored transposed vs PyTorch.
    Padding is exact: padded hidden columns are 0 (survive ReLU as 0) and multiply zero rows of w2;
    padded output columns are 0 + 0 bias and get sliced off.
    """
    hidden = w1.shape[1]
    out_features = w2.shape[1]
    hidden_pad = _round_up(hidden, 128)      # 400 -> 512: clean MXU passes / unmasked vregs
    out_pad = _round_up(out_features, 128)   # lane-dense output -> unmasked vst

    w1p = jnp.pad(w1, ((0, 0), (0, hidden_pad - hidden))).astype(jnp.bfloat16)
    b1p = jnp.pad(b1.reshape(1, -1), ((0, 0), (0, hidden_pad - hidden))).astype(jnp.float32)
    w2p = jnp.pad(w2, ((0, hidden_pad - hidden), (0, out_pad - out_features))).astype(jnp.bfloat16)
    b2p = jnp.pad(b2.reshape(1, -1), ((0, 0), (0, out_pad - out_features))).astype(jnp.float32)
    return (w1p, b1p, w2p, b2p)


@functools.partial(
    jax.jit, static_argnames=("out_features", "block_m", "out_dtype", "slice_output"))
def neural_network_forward(x, w1p, b1p, w2p, b2p, *, out_features,
                           block_m=512, out_dtype=jnp.float32, slice_output=True):
    """x: (B, in) f32. w1p/b1p/w2p/b2p: pre-padded params from prepare_params().

    Computes relu(x @ W1 + b1) @ W2 + b2. Returns (B, out_features) in out_dtype
    (or the padded (B_pad, out_pad) slab if slice_output=False, for fused consumers).
    """
    B, in_features = x.shape
    hidden_pad = w1p.shape[1]
    out_pad = w2p.shape[1]

    # Generation-aware batch tiling:
    #  * small B: one grid step (single TC on v5e/v6e; avoids per-step pipeline overhead)
    #  * large B: >=2 steps, each >=256 rows, so the "parallel" axis uses both v7x TensorCores
    #    while keeping the MXU M dimension filled.
    if B >= 512:
        bm = min(block_m, _round_up(pl.cdiv(B, 2), 8))
    else:
        bm = min(block_m, _round_up(B, 8))
    bm = max(bm, 8)
    b_pad = _round_up(B, bm)
    if b_pad != B:
        x = jnp.pad(x, ((0, b_pad - B), (0, 0)))   # f32 zero-pad only; no dtype cast in the wrapper

    grid = (b_pad // bm,)

    # Advisory cost estimate for XLA scheduling around the custom call.
    flops = 2 * b_pad * (in_features * hidden_pad + hidden_pad * out_pad)
    bytes_accessed = (b_pad * in_features * 4                    # x read (f32)
                      + w1p.size * 2 + w2p.size * 2              # bf16 weights, read once
                      + b1p.size * 4 + b2p.size * 4
                      + b_pad * out_pad * jnp.dtype(out_dtype).itemsize)
    cost = pl.CostEstimate(flops=flops, transcendentals=0, bytes_accessed=bytes_accessed)

    # Explicit VMEM budget: resident weights (counted double-buffered, conservative) +
    # double-buffered x/out tiles + f32/bf16 hidden intermediates, with headroom.
    vmem_bytes = (2 * (w1p.size + w2p.size) * 2
                  + 2 * (b1p.size + b2p.size) * 4
                  + 2 * bm * in_features * 4
                  + 2 * bm * out_pad * jnp.dtype(out_dtype).itemsize
                  + bm * hidden_pad * (4 + 2))
    vmem_limit = int(min(1.5 * vmem_bytes + (4 << 20), 64 << 20))

    out = pl.pallas_call(
        mlp_kernel,
        out_shape=jax.ShapeDtypeStruct((b_pad, out_pad), out_dtype),
        grid_spec=pltpu.PrefetchScalarGridSpec(
            num_scalar_prefetch=0,
            grid=grid,
            in_specs=[
                pl.BlockSpec((bm, in_features), lambda i: (i, 0)),          # x: tiled over rows (f32)
                pl.BlockSpec((in_features, hidden_pad), lambda i: (0, 0)),  # w1: VMEM-resident
                pl.BlockSpec((1, hidden_pad), lambda i: (0, 0)),            # b1: VMEM-resident
                pl.BlockSpec((hidden_pad, out_pad), lambda i: (0, 0)),      # w2: VMEM-resident
                pl.BlockSpec((1, out_pad), lambda i: (0, 0)),               # b2: VMEM-resident
            ],
            out_specs=pl.BlockSpec((bm, out_pad), lambda i: (i, 0)),
        ),
        compiler_params=pltpu.CompilerParams(
            dimension_semantics=("parallel",),   # shards batch tiles across TCs on v7x
            vmem_limit_bytes=vmem_limit,
        ),
        cost_estimate=cost,
    )(x, w1p, b1p, w2p, b2p)

    if not slice_output:
        return out
    return out[:B, :out_features]


def init_params(key, input_size, hidden_size, output_size):
    """Deterministic init mimicking PyTorch nn.Linear default (uniform +/- 1/sqrt(fan_in))."""
    k1, k2, k3, k4 = jax.random.split(key, 4)
    bound1 = 1.0 / jnp.sqrt(jnp.float32(input_size))
    bound2 = 1.0 / jnp.sqrt(jnp.float32(hidden_size))
    w1 = jax.random.uniform(k1, (input_size, hidden_size), jnp.float32, -bound1, bound1)
    b1 = jax.random.uniform(k2, (hidden_size,), jnp.float32, -bound1, bound1)
    w2 = jax.random.uniform(k3, (hidden_size, output_size), jnp.float32, -bound2, bound2)
    b2 = jax.random.uniform(k4, (output_size,), jnp.float32, -bound2, bound2)
    return w1, b1, w2, b2


if __name__ == "__main__":
    input_size = 32
    hidden_size = 400   # fixed by the PyTorch module
    output_size = 16

    key = jax.random.PRNGKey(0)
    kx, kp = jax.random.split(key)
    w1, b1, w2, b2 = init_params(kp, input_size, hidden_size, output_size)

    # One-time parameter prep (hoisted out of the jitted forward).
    params = prepare_params(w1, b1, w2, b2)

    # Two batch sizes: 256 exercises the single-step path, 1000 exercises the
    # 2-step "parallel" grid (dual-TC on v7x) plus the batch-remainder padding path.
    for batch in (256, 1000):
        x = jax.random.normal(jax.random.fold_in(kx, batch), (batch, input_size), jnp.float32)

        out = neural_network_forward(x, *params, out_features=output_size)
        out = jax.block_until_ready(out)

        # Reference with the same bf16-operand / f32-accumulate math (tight tolerance).
        h_ref = jnp.maximum(
            jnp.dot(x.astype(jnp.bfloat16), w1.astype(jnp.bfloat16),
                    preferred_element_type=jnp.float32) + b1, 0.0).astype(jnp.bfloat16)
        ref = jnp.dot(h_ref, w2.astype(jnp.bfloat16),
                      preferred_element_type=jnp.float32) + b2
        # Full-f32 reference (loose tolerance; bf16 MXU operands deviate ~1e-2 rel from
        # the f32 PyTorch module — acceptable for inference).
        ref_f32 = jnp.maximum(x @ w1 + b1, 0.0) @ w2 + b2

        assert out.shape == (batch, output_size)
        assert jnp.allclose(out, ref, atol=2e-3, rtol=2e-3), float(jnp.max(jnp.abs(out - ref)))
        assert jnp.allclose(out, ref_f32, atol=5e-2, rtol=5e-2), float(jnp.max(jnp.abs(out - ref_f32)))

    print("KERNEL_OK")
</pallas_src>

<mosaic_0001>
module attributes {stable_mosaic.version = 11 : i64} {
  func.func @mlp_kernel(%arg0: i32, %arg1: memref<256x32xf32, #tpu.memory_space<vmem>>, %arg2: memref<32x512xbf16, #tpu.memory_space<vmem>>, %arg3: memref<1x512xf32, #tpu.memory_space<vmem>>, %arg4: memref<512x128xbf16, #tpu.memory_space<vmem>>, %arg5: memref<1x128xf32, #tpu.memory_space<vmem>>, %arg6: memref<256x128xf32, #tpu.memory_space<vmem>>) attributes {dimension_semantics = [#tpu.dimension_semantics<parallel>], iteration_bounds = array<i64: 1>, scalar_prefetch = 0 : i64, scratch_operands = 0 : i64, tpu.core_type = #tpu.core_type<tc>, window_params = [{transform_indices = @transform_0, window_bounds = array<i64: 256, 32>}, {pipeline_mode = #tpu.pipeline_mode<synchronous>, transform_indices = @transform_1, window_bounds = array<i64: 32, 512>}, {pipeline_mode = #tpu.pipeline_mode<synchronous>, transform_indices = @transform_2, window_bounds = array<i64: 1, 512>}, {pipeline_mode = #tpu.pipeline_mode<synchronous>, transform_indices = @transform_3, window_bounds = array<i64: 512, 128>}, {pipeline_mode = #tpu.pipeline_mode<synchronous>, transform_indices = @transform_4, window_bounds = array<i64: 1, 128>}, {transform_indices = @transform_5, window_bounds = array<i64: 256, 128>}]} {
    %c0 = arith.constant 0 : index
    %c0_0 = arith.constant 0 : index
    %0 = vector.load %arg1[%c0, %c0_0] : memref<256x32xf32, #tpu.memory_space<vmem>>, vector<256x32xf32>
    %1 = arith.truncf %0 : vector<256x32xf32> to vector<256x32xbf16>
    %c0_1 = arith.constant 0 : index
    %c0_2 = arith.constant 0 : index
    %2 = vector.load %arg2[%c0_1, %c0_2] : memref<32x512xbf16, #tpu.memory_space<vmem>>, vector<32x512xbf16>
    %cst = arith.constant dense<0.000000e+00> : vector<256x512xf32>
    %3 = tpu.matmul %1, %2, %cst {dimension_numbers = #tpu.dot_dimension_numbers<[1], [0], [0], [1], [0, 0, 1, 1], [], []>} : vector<256x32xbf16>, vector<32x512xbf16>, vector<256x512xf32> -> vector<256x512xf32>
    %c0_3 = arith.constant 0 : index
    %c0_4 = arith.constant 0 : index
    %4 = vector.load %arg3[%c0_3, %c0_4] : memref<1x512xf32, #tpu.memory_space<vmem>>, vector<1x512xf32>
    %5 = vector.broadcast %4 : vector<1x512xf32> to vector<256x512xf32>
    %6 = arith.addf %3, %5 : vector<256x512xf32>
    %cst_5 = arith.constant 0.000000e+00 : f32
    %7 = vector.broadcast %cst_5 : f32 to vector<256x512xf32>
    %8 = arith.maximumf %6, %7 : vector<256x512xf32>
    %9 = arith.truncf %8 : vector<256x512xf32> to vector<256x512xbf16>
    %c0_6 = arith.constant 0 : index
    %c0_7 = arith.constant 0 : index
    %10 = vector.load %arg4[%c0_6, %c0_7] : memref<512x128xbf16, #tpu.memory_space<vmem>>, vector<512x128xbf16>
    %cst_8 = arith.constant dense<0.000000e+00> : vector<256x128xf32>
    %11 = tpu.matmul %9, %10, %cst_8 {dimension_numbers = #tpu.dot_dimension_numbers<[1], [0], [0], [1], [0, 0, 1, 1], [], []>} : vector<256x512xbf16>, vector<512x128xbf16>, vector<256x128xf32> -> vector<256x128xf32>
    %c0_9 = arith.constant 0 : index
    %c0_10 = arith.constant 0 : index
    %12 = vector.load %arg5[%c0_9, %c0_10] : memref<1x128xf32, #tpu.memory_space<vmem>>, vector<1x128xf32>
    %13 = vector.broadcast %12 : vector<1x128xf32> to vector<256x128xf32>
    %14 = arith.addf %11, %13 : vector<256x128xf32>
    %c0_11 = arith.constant 0 : index
    %c0_12 = arith.constant 0 : index
    %15 = vector.load %arg6[%c0_11, %c0_12] : memref<256x128xf32, #tpu.memory_space<vmem>>, vector<256x128xf32>
    tpu.vector_store %arg6[%c0_11, %c0_12], %14 {strides = array<i32>} : memref<256x128xf32, #tpu.memory_space<vmem>>, vector<256x128xf32>,
    return
  }
  func.func @transform_0(%arg0: i32) -> (i32, i32) {
    %c0_i32 = arith.constant 0 : i32
    %c0_i32_0 = arith.constant 0 : i32
    return %arg0, %c0_i32 : i32, i32
  }
  func.func @transform_1(%arg0: i32) -> (i32, i32) {
    %c0_i32 = arith.constant 0 : i32
    %c0_i32_0 = arith.constant 0 : i32
    %c0_i32_1 = arith.constant 0 : i32
    return %c0_i32, %c0_i32_0 : i32, i32
  }
  func.func @transform_2(%arg0: i32) -> (i32, i32) {
    %c0_i32 = arith.constant 0 : i32
    %c0_i32_0 = arith.constant 0 : i32
    %c0_i32_1 = arith.constant 0 : i32
    return %c0_i32, %c0_i32_0 : i32, i32
  }
  func.func @transform_3(%arg0: i32) -> (i32, i32) {
    %c0_i32 = arith.constant 0 : i32
    %c0_i32_0 = arith.constant 0 : i32
    %c0_i32_1 = arith.constant 0 : i32
    return %c0_i32, %c0_i32_0 : i32, i32
  }
  func.func @transform_4(%arg0: i32) -> (i32, i32) {
    %c0_i32 = arith.constant 0 : i32
    %c0_i32_0 = arith.constant 0 : i32
    %c0_i32_1 = arith.constant 0 : i32
    return %c0_i32, %c0_i32_0 : i32, i32
  }
  func.func @transform_5(%arg0: i32) -> (i32, i32) {
    %c0_i32 = arith.constant 0 : i32
    %c0_i32_0 = arith.constant 0 : i32
    return %arg0, %c0_i32 : i32, i32
  }
}

</mosaic_0001>

<bundles_post_ra>
// kernel: neural_network_forward.1
= control target key start
LH: loop header
LB: loop body
LE: loop exit
PB: predicated region body
PF: predicated region fallthrough
CT: control target
= control target key end

     0   :  { %10 = vsyncpa [#allocation3], 0  ;;  %s1683_s21 = smov [#allocation2]   ;;  %s2482_s0 = inlined_call_operand.vmem [shape: f32[256,32], index: 0, kind: input, shape index: {}]   ;;  %s2483_s1 = inlined_call_operand.vmem [shape: bf16[32,512], index: 1, kind: input, shape index: {}]   ;;  %s2484_s2 = inlined_call_operand.hbm [shape: f32[1,512], index: 2, kind: input, shape index: {}]   ;;  %s2485_s3 = inlined_call_operand.vmem [shape: bf16[512,128], index: 3, kind: input, shape index: {}]   ;;  %s2486_s4 = inlined_call_operand.vmem [shape: f32[1,128], index: 4, kind: input, shape index: {}]   ;;  %s2487_s5 = inlined_call_operand.vmem [shape: f32[256,128], index: 5, kind: output, shape index: {}]  }
   0x1   :  { %s20_s20 = sshll.u32 %s2484_s2, 4  ;;  %s22_s22 = sshll.u32 %s1683_s21, 4  ;;  %s21_s20 = int_to_ptr.hbm [resolvable:$true] %s20_s20  ;;  %s23_s22 = int_to_ptr.vmem [resolvable:$true] %s22_s22 }
   0x2   :  { %25 = dma.hbm_to_vmem [thread:$0]  %s21_s20, 64, %s23_s22, [#allocation3]  }
   0x3   :  { %1681 = dma.done.wait [#allocation3], 64  }
   0x4   :  { %1682 = vsyncadd [#allocation3], 4294967232  ;;  %v1409_v0 = vld [vmem:[%s2483_s1 + $0x20] sm:$0xf]  ;;  %v1621_v1 = vld [vmem:[%s2483_s1 + $0x2c] sm:$0xf0] }
   0x5   :  { %v1619_v2 = vld [vmem:[%s2483_s1 + $0x24] sm:$0xf]  ;;  %v1410_v3 = vor.u32 %v1621_v1, %v1409_v0  ;;  %v1411_v4 = vld [vmem:[%s2483_s1 + $0x30] sm:$0xf0]  ;;  %v1417_v5 = vld [vmem:[%s2483_s1 + $0x28] sm:$0xf] }
   0x6   :  { %v1622_v6 = vld [vmem:[%s2483_s1 + $0x34] sm:$0xf0]  ;;  %v1414_v7 = vor.u32 %v1619_v2, %v1411_v4  ;;  %v1620_v9 = vld [vmem:[%s2483_s1 + $0x2c] sm:$0xf]  ;;  %v1419_v10 = vld [vmem:[%s2483_s1 + $0x38] sm:$0xf0] }
   0x7   :  { %v1418_v8 = vor.u32 %v1622_v6, %v1417_v5  ;;  %v1393_v11 = vld [vmem:[%s2483_s1] sm:$0xf]  ;;  %196 = vmatpush.bf16.msra.mxu0 %v1410_v3  ;;  %v1422_v12 = vor.u32 %v1620_v9, %v1419_v10  ;;  %v1617_v13 = vld [vmem:[%s2483_s1 + $0xc] sm:$0xf0]  ;;  %v1615_v14 = vld [vmem:[%s2483_s1 + $0x4] sm:$0xf] }
   0x8   :  { %v1395_v15 = vld [vmem:[%s2483_s1 + $0x10] sm:$0xf0]  ;;  %285 = vmatpush.bf16.msra.mxu1 %v1414_v7  ;;  %v1394_v16 = vor.u32 %v1617_v13, %v1393_v11  ;;  %v1401_v18 = vld [vmem:[%s2483_s1 + $0x8] sm:$0xf]  ;;  %v1618_v19 = vld [vmem:[%s2483_s1 + $0x14] sm:$0xf0] }
   0x9   :  { %374 = vmatpush.bf16.msra.mxu2 %v1418_v8  ;;  %v1398_v17 = vor.u32 %v1615_v14, %v1395_v15  ;;  %v1616_v20 = vld [vmem:[%s2483_s1 + $0xc] sm:$0xf]  ;;  %463 = vmatpush.bf16.msra.mxu3 %v1422_v12  ;;  %v1402_v21 = vor.u32 %v1618_v19, %v1401_v18  ;;  %v1403_v22 = vld [vmem:[%s2483_s1 + $0x18] sm:$0xf0]  ;;  %v35_v23 = vld [vmem:[%s2482_s0] sm:$0xff]  ;;  %vm141_vm0 = vcmask 261120  }
   0xa   :  { %v36_v24 = vld [vmem:[%s2482_s0 + $0x8] sm:$0xff]  ;;  %v1406_v25 = vor.u32 %v1616_v20, %v1403_v22  ;;  %v1646_v27 = vld [vmem:[%s2485_s3 + $0xb8] sm:$0xff]  ;;  %v1645_v31 = vld [vmem:[%s2485_s3 + $0xb0] sm:$0xff] }
   0xb   :  { %v67_v26 = vpack.c.bf16 %v36_v24, %v35_v23  ;;  %v1654_v28 = vld [vmem:[%s2485_s3 + $0xf8] sm:$0xff]  ;;  %197 = vmatpush.bf16.msra.mxu0 %v1394_v16  ;;  %v1629_v32 = vld [vmem:[%s2485_s3 + $0x30] sm:$0xff]  ;;  %v39_v38 = vld [vmem:[%s2482_s0 + $0x20] sm:$0xff] }
   0xc   :  { %286 = vmatpush.bf16.msra.mxu1 %v1398_v17  ;;  %v1630_v29 = vld [vmem:[%s2485_s3 + $0x38] sm:$0xff]  ;;  %v1653_v33 = vld [vmem:[%s2485_s3 + $0xf0] sm:$0xff]  ;;  %v40_v39 = vld [vmem:[%s2482_s0 + $0x28] sm:$0xff] }
   0xd   :  { %375 = vmatpush.bf16.msra.mxu2 %v1402_v21  ;;  %464 = vmatpush.bf16.msra.mxu3 %v1406_v25  ;;  %v1638_v30 = vld [vmem:[%s2485_s3 + $0x78] sm:$0xff]  ;;  %v1637_v34 = vld [vmem:[%s2485_s3 + $0x70] sm:$0xff]  ;;  %v69_v40 = vpack.c.bf16 %v40_v39, %v39_v38  ;;  %v1644_v41 = vld [vmem:[%s2485_s3 + $0xa8] sm:$0xff] }
   0xe   :  { %1423 = vmatmul.msk.bf16.vlgmr.msra.gmra.mxu0 %vm141_vm0, %v67_v26  ;;  %v37_v35 = vld [vmem:[%s2482_s0 + $0x10] sm:$0xff]  ;;  %v38_v36 = vld [vmem:[%s2482_s0 + $0x18] sm:$0xff]  ;;  %v1628_v42 = vld [vmem:[%s2485_s3 + $0x28] sm:$0xff] }
   0xf   :  { %1439 = vmatmul.msk.bf16.vlgmr.msra.gmra.mxu1 %vm141_vm0, %v67_v26  ;;  %998 = vmatpush.bf16.msrb.mxu0 %v1630_v29  ;;  %v68_v37 = vpack.c.bf16 %v38_v36, %v37_v35  ;;  %v1652_v43 = vld [vmem:[%s2485_s3 + $0xe8] sm:$0xff]  ;;  %v41_v45 = vld [vmem:[%s2482_s0 + $0x30] sm:$0xff]  ;;  %v42_v46 = vld [vmem:[%s2482_s0 + $0x38] sm:$0xff] }
  0x10   :  { %1455 = vmatmul.msk.bf16.vlgmr.msra.gmra.mxu2 %vm141_vm0, %v67_v26  ;;  %1471 = vmatmul.msk.bf16.vlgmr.msra.gmra.mxu3 %vm141_vm0, %v67_v26  ;;  %v1636_v44 = vld [vmem:[%s2485_s3 + $0x68] sm:$0xff]  ;;  %v70_v47 = vpack.c.bf16 %v42_v46, %v41_v45  ;;  %v43_v48 = vld [vmem:[%s2482_s0 + $0x40] sm:$0xff]  ;;  %v45_v55 = vld [vmem:[%s2482_s0 + $0x50] sm:$0xff] }
  0x11   :  { %1176 = vmatpush.bf16.msrb.mxu2 %v1646_v27  ;;  %1265 = vmatpush.bf16.msrb.mxu3 %v1654_v28  ;;  %v44_v49 = vld [vmem:[%s2482_s0 + $0x48] sm:$0xff]  ;;  %v1643_v51 = vld [vmem:[%s2485_s3 + $0xa0] sm:$0xff]  ;;  %v46_v56 = vld [vmem:[%s2482_s0 + $0x58] sm:$0xff] }
  0x12   :  { %1087 = vmatpush.bf16.msrb.mxu1 %v1638_v30  ;;  %v71_v50 = vpack.c.bf16 %v44_v49, %v43_v48  ;;  %v1627_v52 = vld [vmem:[%s2485_s3 + $0x20] sm:$0xff]  ;;  %v72_v57 = vpack.c.bf16 %v46_v56, %v45_v55  ;;  %v48_v59 = vld [vmem:[%s2482_s0 + $0x68] sm:$0xff]  ;;  %v1642_v61 = vld [vmem:[%s2485_s3 + $0x98] sm:$0xff] }
  0x13   :  { %999 = vmatpush.bf16.msrb.mxu0 %v1629_v32  ;;  %v1651_v53 = vld [vmem:[%s2485_s3 + $0xe0] sm:$0xff]  ;;  %v1626_v62 = vld [vmem:[%s2485_s3 + $0x18] sm:$0xff]  ;;  %v49_v1 = vld [vmem:[%s2482_s0 + $0x70] sm:$0xff] }
  0x14   :  { %v1635_v54 = vld [vmem:[%s2485_s3 + $0x60] sm:$0xff]  ;;  %v1650_v63 = vld [vmem:[%s2485_s3 + $0xd8] sm:$0xff]  ;;  %v52_v5 = vld [vmem:[%s2482_s0 + $0x88] sm:$0xff] }
  0x15   :  { %1177 = vmatpush.bf16.msrb.mxu2 %v1645_v31  ;;  %1266 = vmatpush.bf16.msrb.mxu3 %v1653_v33  ;;  %v47_v58 = vld [vmem:[%s2482_s0 + $0x60] sm:$0xff]  ;;  %v1634_v0 = vld [vmem:[%s2485_s3 + $0x58] sm:$0xff]  ;;  %v1641_v12 = vld [vmem:[%s2485_s3 + $0x90] sm:$0xff] }
  0x16   :  { %1088 = vmatpush.bf16.msrb.mxu1 %v1637_v34  ;;  %v73_v60 = vpack.c.bf16 %v48_v59, %v47_v58  ;;  %v50_v2 = vld [vmem:[%s2482_s0 + $0x78] sm:$0xff]  ;;  %v51_v4 = vld [vmem:[%s2482_s0 + $0x80] sm:$0xff]  ;;  %v1625_v13 = vld [vmem:[%s2485_s3 + $0x10] sm:$0xff] }
  0x17   :  { %1000 = vmatpush.bf16.msrb.mxu0 %v1628_v42  ;;  %v74_v3 = vpack.c.bf16 %v50_v2, %v49_v1  ;;  %v75_v6 = vpack.c.bf16 %v52_v5, %v51_v4  ;;  %v91_v7 = vld [vmem:[#allocation2] sm:$0xf]  ;;  %v1649_v14 = vld [vmem:[%s2485_s3 + $0xd0] sm:$0xff]  ;;  %v54_v31 = vld [vmem:[%s2482_s0 + $0x98] sm:$0xff] }
  0x18   :  { %v1911_v10 = vperm.slane %v91_v7, 0  ;;  %v1914_v11 = vperm.slane %v91_v7, 1  ;;  %v1931_v22 = vperm.slane %v91_v7, 2  ;;  %v1934_v25 = vperm.slane %v91_v7, 3  ;;  %v1633_v27 = vld [vmem:[%s2485_s3 + $0x50] sm:$0xff] }
  0x19   :  { %1178 = vmatpush.bf16.msrb.mxu2 %v1644_v41  ;;  %1267 = vmatpush.bf16.msrb.mxu3 %v1652_v43  ;;  %v53_v30 = vld [vmem:[%s2482_s0 + $0x90] sm:$0xff] }
  0x1a   :  { %1089 = vmatpush.bf16.msrb.mxu1 %v1636_v44 }
  0x1b   :  { %1001 = vmatpush.bf16.msrb.mxu0 %v1627_v52 }
  0x1d   :  { %1179 = vmatpush.bf16.msrb.mxu2 %v1643_v51  ;;  %1268 = vmatpush.bf16.msrb.mxu3 %v1651_v53 }
  0x1e   :  { %1424 = vmatmul.msk.bf16.gmra.mxu0 %vm141_vm0, %v68_v37  ;;  %1090 = vmatpush.bf16.msrb.mxu1 %v1635_v54 }
  0x1f   :  { %1440 = vmatmul.msk.bf16.gmra.mxu1 %vm141_vm0, %v68_v37  ;;  %1002 = vmatpush.bf16.msrb.mxu0 %v1626_v62  ;;  %v56_v62 = vld [vmem:[%s2482_s0 + $0xa8] sm:$0xff] }
  0x20   :  { %1456 = vmatmul.msk.bf16.gmra.mxu2 %vm141_vm0, %v68_v37  ;;  %1472 = vmatmul.msk.bf16.gmra.mxu3 %vm141_vm0, %v68_v37  ;;  %v76_v37 = vpack.c.bf16 %v54_v31, %v53_v30 }
  0x21   :  { %1180 = vmatpush.bf16.msrb.mxu2 %v1642_v61  ;;  %1269 = vmatpush.bf16.msrb.mxu3 %v1650_v63  ;;  %v55_v61 = vld [vmem:[%s2482_s0 + $0xa0] sm:$0xff] }
  0x22   :  { %1091 = vmatpush.bf16.msrb.mxu1 %v1634_v0  ;;  %v77_v4 = vpack.c.bf16 %v56_v62, %v55_v61 }
  0x23   :  { %1003 = vmatpush.bf16.msrb.mxu0 %v1625_v13 }
  0x25   :  { %1181 = vmatpush.bf16.msrb.mxu2 %v1641_v12  ;;  %1270 = vmatpush.bf16.msrb.mxu3 %v1649_v14 }
  0x26   :  { %1092 = vmatpush.bf16.msrb.mxu1 %v1633_v27 }
  0x2e   :  { %1425 = vmatmul.msk.bf16.gmra.mxu0 %vm141_vm0, %v69_v40 }
  0x2f   :  { %1441 = vmatmul.msk.bf16.gmra.mxu1 %vm141_vm0, %v69_v40 }
  0x30   :  { %1457 = vmatmul.msk.bf16.gmra.mxu2 %vm141_vm0, %v69_v40  ;;  %1473 = vmatmul.msk.bf16.gmra.mxu3 %vm141_vm0, %v69_v40 }
  0x3e   :  { %1426 = vmatmul.msk.bf16.gmra.mxu0 %vm141_vm0, %v70_v47 }
  0x3f   :  { %1442 = vmatmul.msk.bf16.gmra.mxu1 %vm141_vm0, %v70_v47 }
  0x40   :  { %1458 = vmatmul.msk.bf16.gmra.mxu2 %vm141_vm0, %v70_v47  ;;  %1474 = vmatmul.msk.bf16.gmra.mxu3 %vm141_vm0, %v70_v47 }
  0x4e   :  { %1427 = vmatmul.msk.bf16.gmra.mxu0 %vm141_vm0, %v71_v50 }
  0x4f   :  { %1443 = vmatmul.msk.bf16.gmra.mxu1 %vm141_vm0, %v71_v50 }
  0x50   :  { %1459 = vmatmul.msk.bf16.gmra.mxu2 %vm141_vm0, %v71_v50  ;;  %1475 = vmatmul.msk.bf16.gmra.mxu3 %vm141_vm0, %v71_v50 }
  0x5e   :  { %1428 = vmatmul.msk.bf16.gmra.mxu0 %vm141_vm0, %v72_v57 }
  0x5f   :  { %1444 = vmatmul.msk.bf16.gmra.mxu1 %vm141_vm0, %v72_v57 }
  0x60   :  { %1460 = vmatmul.msk.bf16.gmra.mxu2 %vm141_vm0, %v72_v57  ;;  %1476 = vmatmul.msk.bf16.gmra.mxu3 %vm141_vm0, %v72_v57 }
  0x6e   :  { %1429 = vmatmul.msk.bf16.gmra.mxu0 %vm141_vm0, %v73_v60 }
  0x6f   :  { %1445 = vmatmul.msk.bf16.gmra.mxu1 %vm141_vm0, %v73_v60 }
  0x70   :  { %1461 = vmatmul.msk.bf16.gmra.mxu2 %vm141_vm0, %v73_v60  ;;  %1477 = vmatmul.msk.bf16.gmra.mxu3 %vm141_vm0, %v73_v60 }
  0x7e   :  { %1430 = vmatmul.msk.bf16.gmra.mxu0 %vm141_vm0, %v74_v3 }
  0x7f   :  { %1446 = vmatmul.msk.bf16.gmra.mxu1 %vm141_vm0, %v74_v3 }
  0x80   :  { %1462 = vmatmul.msk.bf16.gmra.mxu2 %vm141_vm0, %v74_v3  ;;  %1478 = vmatmul.msk.bf16.gmra.mxu3 %vm141_vm0, %v74_v3 }
  0x8b   :  { %v199_v8 = vpop.f32.mrf.mxu0 }
  0x8c   :  { %v288_v9 = vpop.f32.mrf.mxu1  ;;  %v200_v15 = vadd.f32 %v199_v8, %v1911_v10 }
  0x8d   :  { %v289_v17 = vadd.f32 %v288_v9, %v1914_v11 }
  0x8e   :  { %1431 = vmatmul.msk.bf16.gmra.mxu0 %vm141_vm0, %v75_v6  ;;  %v546_v24 = vmax.f32 %v200_v15, 0.0 }
  0x8f   :  { %1447 = vmatmul.msk.bf16.gmra.mxu1 %vm141_vm0, %v75_v6  ;;  %v547_v28 = vmax.f32 %v289_v17, 0.0  ;;  %v1640_v17 = vld [vmem:[%s2485_s3 + $0x88] sm:$0xff] }
  0x90   :  { %1463 = vmatmul.msk.bf16.gmra.mxu2 %vm141_vm0, %v75_v6  ;;  %1479 = vmatmul.msk.bf16.gmra.mxu3 %vm141_vm0, %v75_v6 }
  0x91   :  { %1182 = vmatpush.bf16.msrb.mxu2 %v1640_v17 }
  0x93   :  { %v377_v16 = vpop.f32.mrf.mxu2  ;;  %v466_v18 = vpop.f32.mrf.mxu3 }
  0x94   :  { %v201_v19 = vpop.f32.mrf.mxu0  ;;  %v290_v21 = vpop.f32.mrf.mxu1  ;;  %v378_v33 = vadd.f32 %v377_v16, %v1931_v22  ;;  %v467_v35 = vadd.f32 %v466_v18, %v1934_v25  ;;  %v1624_v18 = vld [vmem:[%s2485_s3 + $0x8] sm:$0xff] }
  0x95   :  { %v202_v20 = vadd.f32 %v201_v19, %v1911_v10  ;;  %v291_v23 = vadd.f32 %v290_v21, %v1914_v11  ;;  %v1648_v19 = vld [vmem:[%s2485_s3 + $0xc8] sm:$0xff]  ;;  %1004 = vmatpush.bf16.msrb.mxu0 %v1624_v18 }
  0x96   :  { %v548_v43 = vmax.f32 %v378_v33, 0.0  ;;  %v549_v45 = vmax.f32 %v467_v35, 0.0  ;;  %1271 = vmatpush.bf16.msrb.mxu3 %v1648_v19  ;;  %v1632_v35 = vld [vmem:[%s2485_s3 + $0x48] sm:$0xff] }
  0x97   :  { %v550_v26 = vmax.f32 %v202_v20, 0.0  ;;  %v551_v29 = vmax.f32 %v291_v23, 0.0  ;;  %1093 = vmatpush.bf16.msrb.mxu1 %v1632_v35  ;;  %v1639_v35 = vld [vmem:[%s2485_s3 + $0x80] sm:$0xff] }
  0x98   :  { %1183 = vmatpush.bf16.msrb.mxu2 %v1639_v35 }
  0x99   :  { %v1945_v32 = vpack.c.bf16 %v550_v26, %v546_v24  ;;  %v1948_v34 = vpack.c.bf16 %v551_v29, %v547_v28 }
  0x9b   :  { %v379_v36 = vpop.f32.mrf.mxu2  ;;  %v468_v39 = vpop.f32.mrf.mxu3 }
  0x9c   :  { %v380_v38 = vadd.f32 %v379_v36, %v1931_v22  ;;  %v204_v40 = vpop.f32.mrf.mxu0  ;;  %v469_v41 = vadd.f32 %v468_v39, %v1934_v25  ;;  %v293_v42 = vpop.f32.mrf.mxu1  ;;  %v58_v39 = vld [vmem:[%s2482_s0 + $0xb8] sm:$0xff] }
  0x9d   :  { %v205_v49 = vadd.f32 %v204_v40, %v1911_v10  ;;  %v294_v51 = vadd.f32 %v293_v42, %v1914_v11 }
  0x9e   :  { %v552_v44 = vmax.f32 %v380_v38, 0.0  ;;  %v553_v46 = vmax.f32 %v469_v41, 0.0  ;;  %1432 = vmatmul.msk.bf16.gmra.mxu0 %vm141_vm0, %v76_v37  ;;  %v57_v38 = vld [vmem:[%s2482_s0 + $0xb0] sm:$0xff] }
  0x9f   :  { %1448 = vmatmul.msk.bf16.gmra.mxu1 %vm141_vm0, %v76_v37  ;;  %v554_v57 = vmax.f32 %v205_v49, 0.0  ;;  %v555_v59 = vmax.f32 %v294_v51, 0.0 }
  0xa0   :  { %v1954_v47 = vpack.c.bf16 %v552_v44, %v548_v43  ;;  %1464 = vmatmul.msk.bf16.gmra.mxu2 %vm141_vm0, %v76_v37  ;;  %v1958_v48 = vpack.c.bf16 %v553_v46, %v549_v45  ;;  %1480 = vmatmul.msk.bf16.gmra.mxu3 %vm141_vm0, %v76_v37  ;;  %v78_v45 = vpack.c.bf16 %v58_v39, %v57_v38 }
  0xa3   :  { %v382_v50 = vpop.f32.mrf.mxu2  ;;  %v471_v52 = vpop.f32.mrf.mxu3 }
  0xa4   :  { %v206_v53 = vpop.f32.mrf.mxu0  ;;  %v295_v55 = vpop.f32.mrf.mxu1  ;;  %v383_v0 = vadd.f32 %v382_v50, %v1931_v22  ;;  %v472_v2 = vadd.f32 %v471_v52, %v1934_v25 }
  0xa5   :  { %v207_v54 = vadd.f32 %v206_v53, %v1911_v10  ;;  %v296_v56 = vadd.f32 %v295_v55, %v1914_v11 }
  0xa6   :  { %v556_v12 = vmax.f32 %v383_v0, 0.0  ;;  %v557_v14 = vmax.f32 %v472_v2, 0.0 }
  0xa7   :  { %v558_v58 = vmax.f32 %v207_v54, 0.0  ;;  %v559_v60 = vmax.f32 %v296_v56, 0.0 }
  0xa9   :  { %v1971_v63 = vpack.c.bf16 %v558_v58, %v554_v57  ;;  %v1974_v1 = vpack.c.bf16 %v559_v60, %v555_v59 }
  0xab   :  { %v384_v3 = vpop.f32.mrf.mxu2  ;;  %v473_v6 = vpop.f32.mrf.mxu3 }
  0xac   :  { %v385_v5 = vadd.f32 %v384_v3, %v1931_v22  ;;  %v209_v7 = vpop.f32.mrf.mxu0  ;;  %v474_v8 = vadd.f32 %v473_v6, %v1934_v25  ;;  %v298_v9 = vpop.f32.mrf.mxu1 }
  0xad   :  { %v210_v21 = vadd.f32 %v209_v7, %v1911_v10  ;;  %v299_v24 = vadd.f32 %v298_v9, %v1914_v11  ;;  %v59_v9 = vld [vmem:[%s2482_s0 + $0xc0] sm:$0xff] }
  0xae   :  { %v560_v13 = vmax.f32 %v385_v5, 0.0  ;;  %v561_v15 = vmax.f32 %v474_v8, 0.0  ;;  %1433 = vmatmul.msk.bf16.gmra.mxu0 %vm141_vm0, %v77_v4 }
  0xaf   :  { %1449 = vmatmul.msk.bf16.gmra.mxu1 %vm141_vm0, %v77_v4  ;;  %v562_v31 = vmax.f32 %v210_v21, 0.0  ;;  %v563_v36 = vmax.f32 %v299_v24, 0.0 }
  0xb0   :  { %1465 = vmatmul.msk.bf16.gmra.mxu2 %vm141_vm0, %v77_v4  ;;  %v1982_v16 = vpack.c.bf16 %v560_v13, %v556_v12  ;;  %1481 = vmatmul.msk.bf16.gmra.mxu3 %vm141_vm0, %v77_v4  ;;  %v1994_v20 = vpack.c.bf16 %v561_v15, %v557_v14  ;;  %v60_v12 = vld [vmem:[%s2482_s0 + $0xc8] sm:$0xff] }
  0xb1   :  { %v79_v19 = vpack.c.bf16 %v60_v12, %v59_v9 }
  0xb3   :  { %v387_v23 = vpop.f32.mrf.mxu2  ;;  %v476_v26 = vpop.f32.mrf.mxu3 }
  0xb4   :  { %v211_v27 = vpop.f32.mrf.mxu0  ;;  %v300_v29 = vpop.f32.mrf.mxu1  ;;  %v388_v41 = vadd.f32 %v387_v23, %v1931_v22  ;;  %v477_v43 = vadd.f32 %v476_v26, %v1934_v25 }
  0xb5   :  { %v212_v28 = vadd.f32 %v211_v27, %v1911_v10  ;;  %v301_v30 = vadd.f32 %v300_v29, %v1914_v11 }
  0xb6   :  { %v564_v53 = vmax.f32 %v388_v41, 0.0  ;;  %v565_v55 = vmax.f32 %v477_v43, 0.0 }
  0xb7   :  { %v566_v33 = vmax.f32 %v212_v28, 0.0  ;;  %v567_v37 = vmax.f32 %v301_v30, 0.0 }
  0xb9   :  { %v2009_v40 = vpack.c.bf16 %v566_v33, %v562_v31  ;;  %v2012_v42 = vpack.c.bf16 %v567_v37, %v563_v36  ;;  %v1623_v36 = vld [vmem:[%s2485_s3] sm:$0xff] }
  0xba   :  { %v1647_v37 = vld [vmem:[%s2485_s3 + $0xc0] sm:$0xff]  ;;  %1005 = vmatpush.bf16.msrb.mxu0 %v1623_v36 }
  0xbb   :  { %v389_v44 = vpop.f32.mrf.mxu2  ;;  %v478_v49 = vpop.f32.mrf.mxu3  ;;  %1272 = vmatpush.bf16.msrb.mxu3 %v1647_v37 }
  0xbc   :  { %v390_v46 = vadd.f32 %v389_v44, %v1931_v22  ;;  %v214_v50 = vpop.f32.mrf.mxu0  ;;  %v479_v51 = vadd.f32 %v478_v49, %v1934_v25  ;;  %v303_v52 = vpop.f32.mrf.mxu1 }
  0xbd   :  { %v215_v59 = vadd.f32 %v214_v50, %v1911_v10  ;;  %v304_v61 = vadd.f32 %v303_v52, %v1914_v11 }
  0xbe   :  { %v568_v54 = vmax.f32 %v390_v46, 0.0  ;;  %v569_v56 = vmax.f32 %v479_v51, 0.0  ;;  %1434 = vmatmul.msk.bf16.gmra.mxu0 %vm141_vm0, %v78_v45 }
  0xbf   :  { %1450 = vmatmul.msk.bf16.gmra.mxu1 %vm141_vm0, %v78_v45  ;;  %v570_v5 = vmax.f32 %v215_v59, 0.0  ;;  %v571_v7 = vmax.f32 %v304_v61, 0.0  ;;  %v62_v59 = vld [vmem:[%s2482_s0 + $0xd8] sm:$0xff] }
  0xc0   :  { %1466 = vmatmul.msk.bf16.gmra.mxu2 %vm141_vm0, %v78_v45  ;;  %v2020_v57 = vpack.c.bf16 %v568_v54, %v564_v53  ;;  %1482 = vmatmul.msk.bf16.gmra.mxu3 %vm141_vm0, %v78_v45  ;;  %v2023_v58 = vpack.c.bf16 %v569_v56, %v565_v55  ;;  %v1631_v53 = vld [vmem:[%s2485_s3 + $0x40] sm:$0xff]  ;;  %v61_v56 = vld [vmem:[%s2482_s0 + $0xd0] sm:$0xff] }
  0xc1   :  { %1094 = vmatpush.bf16.msrb.mxu1 %v1631_v53 }
  0xc3   :  { %v392_v60 = vpop.f32.mrf.mxu2  ;;  %v481_v62 = vpop.f32.mrf.mxu3 }
  0xc4   :  { %v216_v0 = vpop.f32.mrf.mxu0  ;;  %v305_v3 = vpop.f32.mrf.mxu1  ;;  %v393_v14 = vadd.f32 %v392_v60, %v1931_v22  ;;  %v482_v17 = vadd.f32 %v481_v62, %v1934_v25 }
  0xc5   :  { %v217_v2 = vadd.f32 %v216_v0, %v1911_v10  ;;  %v306_v4 = vadd.f32 %v305_v3, %v1914_v11  ;;  %v80_v3 = vpack.c.bf16 %v62_v59, %v61_v56 }
  0xc6   :  { %v572_v28 = vmax.f32 %v393_v14, 0.0  ;;  %v573_v30 = vmax.f32 %v482_v17, 0.0 }
  0xc7   :  { %v574_v6 = vmax.f32 %v217_v2, 0.0  ;;  %v575_v8 = vmax.f32 %v306_v4, 0.0 }
  0xc9   :  { %v2035_v13 = vpack.c.bf16 %v574_v6, %v570_v5  ;;  %v2038_v15 = vpack.c.bf16 %v575_v8, %v571_v7 }
  0xcb   :  { %v394_v18 = vpop.f32.mrf.mxu2  ;;  %v483_v23 = vpop.f32.mrf.mxu3 }
  0xcc   :  { %v395_v21 = vadd.f32 %v394_v18, %v1931_v22  ;;  %v219_v24 = vpop.f32.mrf.mxu0  ;;  %v484_v26 = vadd.f32 %v483_v23, %v1934_v25  ;;  %v308_v27 = vpop.f32.mrf.mxu1 }
  0xcd   :  { %v220_v39 = vadd.f32 %v219_v24, %v1911_v10  ;;  %v309_v43 = vadd.f32 %v308_v27, %v1914_v11 }
  0xce   :  { %v576_v29 = vmax.f32 %v395_v21, 0.0  ;;  %v577_v31 = vmax.f32 %v484_v26, 0.0  ;;  %1435 = vmatmul.msk.bf16.gmra.mxu0 %vm141_vm0, %v79_v19 }
  0xcf   :  { %1451 = vmatmul.msk.bf16.gmra.mxu1 %vm141_vm0, %v79_v19  ;;  %v578_v51 = vmax.f32 %v220_v39, 0.0  ;;  %v579_v54 = vmax.f32 %v309_v43, 0.0  ;;  %v63_v39 = vld [vmem:[%s2482_s0 + $0xe0] sm:$0xff] }
  0xd0   :  { %1467 = vmatmul.msk.bf16.gmra.mxu2 %vm141_vm0, %v79_v19  ;;  %v2046_v33 = vpack.c.bf16 %v576_v29, %v572_v28  ;;  %1483 = vmatmul.msk.bf16.gmra.mxu3 %vm141_vm0, %v79_v19  ;;  %v2058_v38 = vpack.c.bf16 %v577_v31, %v573_v30 }
  0xd3   :  { %v397_v41 = vpop.f32.mrf.mxu2  ;;  %v486_v44 = vpop.f32.mrf.mxu3 }
  0xd4   :  { %v221_v45 = vpop.f32.mrf.mxu0  ;;  %v310_v49 = vpop.f32.mrf.mxu1  ;;  %v398_v61 = vadd.f32 %v397_v41, %v1931_v22  ;;  %v487_v0 = vadd.f32 %v486_v44, %v1934_v25  ;;  %v64_v41 = vld [vmem:[%s2482_s0 + $0xe8] sm:$0xff] }
  0xd5   :  { %v222_v46 = vadd.f32 %v221_v45, %v1911_v10  ;;  %v311_v50 = vadd.f32 %v310_v49, %v1914_v11 }
  0xd6   :  { %v580_v9 = vmax.f32 %v398_v61, 0.0  ;;  %v581_v14 = vmax.f32 %v487_v0, 0.0 }
  0xd7   :  { %v582_v52 = vmax.f32 %v222_v46, 0.0  ;;  %v583_v55 = vmax.f32 %v311_v50, 0.0  ;;  %v81_v50 = vpack.c.bf16 %v64_v41, %v63_v39 }
  0xd9   :  { %v2073_v60 = vpack.c.bf16 %v582_v52, %v578_v51  ;;  %v2076_v62 = vpack.c.bf16 %v583_v55, %v579_v54 }
  0xdb   :  { %v399_v2 = vpop.f32.mrf.mxu2  ;;  %v488_v5 = vpop.f32.mrf.mxu3 }
  0xdc   :  { %v400_v4 = vadd.f32 %v399_v2, %v1931_v22  ;;  %v224_v6 = vpop.f32.mrf.mxu0  ;;  %v489_v7 = vadd.f32 %v488_v5, %v1934_v25  ;;  %v313_v8 = vpop.f32.mrf.mxu1 }
  0xdd   :  { %v225_v21 = vadd.f32 %v224_v6, %v1911_v10  ;;  %v314_v24 = vadd.f32 %v313_v8, %v1914_v11 }
  0xde   :  { %v584_v12 = vmax.f32 %v400_v4, 0.0  ;;  %v585_v17 = vmax.f32 %v489_v7, 0.0  ;;  %1436 = vmatmul.msk.bf16.gmra.mxu0 %vm141_vm0, %v80_v3 }
  0xdf   :  { %1452 = vmatmul.msk.bf16.gmra.mxu1 %vm141_vm0, %v80_v3  ;;  %v586_v31 = vmax.f32 %v225_v21, 0.0  ;;  %v587_v36 = vmax.f32 %v314_v24, 0.0 }
  0xe0   :  { %1468 = vmatmul.msk.bf16.gmra.mxu2 %vm141_vm0, %v80_v3  ;;  %v2084_v18 = vpack.c.bf16 %v584_v12, %v580_v9  ;;  %1484 = vmatmul.msk.bf16.gmra.mxu3 %vm141_vm0, %v80_v3  ;;  %v2087_v19 = vpack.c.bf16 %v585_v17, %v581_v14 }
  0xe3   :  { %v402_v23 = vpop.f32.mrf.mxu2  ;;  %v491_v26 = vpop.f32.mrf.mxu3 }
  0xe4   :  { %v226_v27 = vpop.f32.mrf.mxu0  ;;  %v315_v29 = vpop.f32.mrf.mxu1  ;;  %v403_v44 = vadd.f32 %v402_v23, %v1931_v22  ;;  %v492_v46 = vadd.f32 %v491_v26, %v1934_v25  ;;  %v65_v26 = vld [vmem:[%s2482_s0 + $0xf0] sm:$0xff] }
  0xe5   :  { %v227_v28 = vadd.f32 %v226_v27, %v1911_v10  ;;  %v316_v30 = vadd.f32 %v315_v29, %v1914_v11  ;;  %v66_v27 = vld [vmem:[%s2482_s0 + $0xf8] sm:$0xff] }
  0xe6   :  { %v588_v56 = vmax.f32 %v403_v44, 0.0  ;;  %v589_v61 = vmax.f32 %v492_v46, 0.0 }
  0xe7   :  { %v590_v35 = vmax.f32 %v227_v28, 0.0  ;;  %v591_v37 = vmax.f32 %v316_v30, 0.0 }
  0xe9   :  { %v2099_v43 = vpack.c.bf16 %v590_v35, %v586_v31  ;;  %v2102_v45 = vpack.c.bf16 %v591_v37, %v587_v36  ;;  %v82_v36 = vpack.c.bf16 %v66_v27, %v65_v26 }
  0xeb   :  { %v404_v49 = vpop.f32.mrf.mxu2  ;;  %v493_v52 = vpop.f32.mrf.mxu3 }
  0xec   :  { %v405_v51 = vadd.f32 %v404_v49, %v1931_v22  ;;  %v229_v53 = vpop.f32.mrf.mxu0  ;;  %v494_v54 = vadd.f32 %v493_v52, %v1934_v25  ;;  %v318_v55 = vpop.f32.mrf.mxu1 }
  0xed   :  { %v230_v4 = vadd.f32 %v229_v53, %v1911_v10  ;;  %v319_v6 = vadd.f32 %v318_v55, %v1914_v11 }
  0xee   :  { %v592_v59 = vmax.f32 %v405_v51, 0.0  ;;  %v593_v0 = vmax.f32 %v494_v54, 0.0  ;;  %1437 = vmatmul.msk.bf16.gmra.mxu0 %vm141_vm0, %v81_v50 }
  0xef   :  { %1453 = vmatmul.msk.bf16.gmra.mxu1 %vm141_vm0, %v81_v50  ;;  %v594_v17 = vmax.f32 %v230_v4, 0.0  ;;  %v595_v23 = vmax.f32 %v319_v6, 0.0 }
  0xf0   :  { %1469 = vmatmul.msk.bf16.gmra.mxu2 %vm141_vm0, %v81_v50  ;;  %v2110_v2 = vpack.c.bf16 %v592_v59, %v588_v56  ;;  %1485 = vmatmul.msk.bf16.gmra.mxu3 %vm141_vm0, %v81_v50  ;;  %v2113_v3 = vpack.c.bf16 %v593_v0, %v589_v61 }
  0xf3   :  { %v407_v5 = vpop.f32.mrf.mxu2  ;;  %v496_v7 = vpop.f32.mrf.mxu3 }
  0xf4   :  { %v231_v8 = vpop.f32.mrf.mxu0  ;;  %v320_v12 = vpop.f32.mrf.mxu1  ;;  %v408_v29 = vadd.f32 %v407_v5, %v1931_v22  ;;  %v497_v31 = vadd.f32 %v496_v7, %v1934_v25 }
  0xf5   :  { %v232_v9 = vadd.f32 %v231_v8, %v1911_v10  ;;  %v321_v14 = vadd.f32 %v320_v12, %v1914_v11 }
  0xf6   :  { %v596_v49 = vmax.f32 %v408_v29, 0.0  ;;  %v597_v51 = vmax.f32 %v497_v31, 0.0 }
  0xf7   :  { %v598_v21 = vmax.f32 %v232_v9, 0.0  ;;  %v599_v24 = vmax.f32 %v321_v14, 0.0 }
  0xf9   :  { %v2125_v28 = vpack.c.bf16 %v598_v21, %v594_v17  ;;  %v2128_v30 = vpack.c.bf16 %v599_v24, %v595_v23 }
  0xfb   :  { %v409_v35 = vpop.f32.mrf.mxu2  ;;  %v498_v39 = vpop.f32.mrf.mxu3 }
  0xfc   :  { %v410_v37 = vadd.f32 %v409_v35, %v1931_v22  ;;  %v234_v41 = vpop.f32.mrf.mxu0  ;;  %v499_v44 = vadd.f32 %v498_v39, %v1934_v25  ;;  %v323_v46 = vpop.f32.mrf.mxu1 }
  0xfd   :  { %v235_v55 = vadd.f32 %v234_v41, %v1911_v10  ;;  %v324_v59 = vadd.f32 %v323_v46, %v1914_v11 }
  0xfe   :  { %v600_v50 = vmax.f32 %v410_v37, 0.0  ;;  %v601_v52 = vmax.f32 %v499_v44, 0.0  ;;  %1438 = vmatmul.msk.bf16.gmra.mxu0 %vm141_vm0, %v82_v36 }
  0xff   :  { %1454 = vmatmul.msk.bf16.gmra.mxu1 %vm141_vm0, %v82_v36  ;;  %v602_v7 = vmax.f32 %v235_v55, 0.0  ;;  %v603_v9 = vmax.f32 %v324_v59, 0.0 }
 0x100   :  { %1470 = vmatmul.msk.bf16.gmra.mxu2 %vm141_vm0, %v82_v36  ;;  %v2136_v53 = vpack.c.bf16 %v600_v50, %v596_v49  ;;  %1486 = vmatmul.msk.bf16.gmra.mxu3 %vm141_vm0, %v82_v36  ;;  %v2139_v54 = vpack.c.bf16 %v601_v52, %v597_v51 }
 0x103   :  { %v412_v56 = vpop.f32.mrf.mxu2  ;;  %v501_v61 = vpop.f32.mrf.mxu3 }
 0x104   :  { %v236_v0 = vpop.f32.mrf.mxu0  ;;  %v325_v5 = vpop.f32.mrf.mxu1  ;;  %v413_v17 = vadd.f32 %v412_v56, %v1931_v22  ;;  %v502_v23 = vadd.f32 %v501_v61, %v1934_v25 }
 0x105   :  { %v237_v4 = vadd.f32 %v236_v0, %v1911_v10  ;;  %v326_v6 = vadd.f32 %v325_v5, %v1914_v11 }
 0x106   :  { %v604_v36 = vmax.f32 %v413_v17, 0.0  ;;  %v605_v39 = vmax.f32 %v502_v23, 0.0 }
 0x107   :  { %v606_v8 = vmax.f32 %v237_v4, 0.0  ;;  %v607_v12 = vmax.f32 %v326_v6, 0.0 }
 0x109   :  { %v2145_v14 = vpack.c.bf16 %v606_v8, %v602_v7  ;;  %v2148_v21 = vpack.c.bf16 %v607_v12, %v603_v9 }
 0x10b   :  { %v414_v24 = vpop.f32.mrf.mxu2  ;;  %v503_v27 = vpop.f32.mrf.mxu3 }
 0x10c   :  { %v415_v26 = vadd.f32 %v414_v24, %v1931_v22  ;;  %v239_v29 = vpop.f32.mrf.mxu0  ;;  %v504_v31 = vadd.f32 %v503_v27, %v1934_v25  ;;  %v328_v35 = vpop.f32.mrf.mxu1 }
 0x10d   :  { %v240_v49 = vadd.f32 %v239_v29, %v1911_v10  ;;  %v329_v51 = vadd.f32 %v328_v35, %v1914_v11 }
 0x10e   :  { %v608_v37 = vmax.f32 %v415_v26, 0.0  ;;  %v609_v41 = vmax.f32 %v504_v31, 0.0  ;;  %1006 = vmatmul.bf16.vlgmr.msrb.gmra.mxu0 %v1945_v32 }
 0x10f   :  { %1095 = vmatmul.bf16.vlgmr.msrb.gmra.mxu1 %v1948_v34  ;;  %v610_v59 = vmax.f32 %v240_v49, 0.0  ;;  %v611_v61 = vmax.f32 %v329_v51, 0.0 }
 0x110   :  { %1184 = vmatmul.bf16.vlgmr.msrb.gmra.mxu2 %v1954_v47  ;;  %v2156_v44 = vpack.c.bf16 %v608_v37, %v604_v36  ;;  %1273 = vmatmul.bf16.vlgmr.msrb.gmra.mxu3 %v1958_v48  ;;  %v2159_v46 = vpack.c.bf16 %v609_v41, %v605_v39 }
 0x113   :  { %v417_v50 = vpop.f32.mrf.mxu2  ;;  %v506_v52 = vpop.f32.mrf.mxu3 }
 0x114   :  { %v241_v55 = vpop.f32.mrf.mxu0  ;;  %v330_v32 = vpop.f32.mrf.mxu1  ;;  %v418_v48 = vadd.f32 %v417_v50, %v1931_v22  ;;  %v507_v6 = vadd.f32 %v506_v52, %v1934_v25 }
 0x115   :  { %v242_v56 = vadd.f32 %v241_v55, %v1911_v10  ;;  %v331_v34 = vadd.f32 %v330_v32, %v1914_v11 }
 0x116   :  { %v612_v24 = vmax.f32 %v418_v48, 0.0  ;;  %v613_v27 = vmax.f32 %v507_v6, 0.0 }
 0x117   :  { %v614_v47 = vmax.f32 %v242_v56, 0.0  ;;  %v615_v0 = vmax.f32 %v331_v34, 0.0 }
 0x119   :  { %v2165_v4 = vpack.c.bf16 %v614_v47, %v610_v59  ;;  %v2168_v5 = vpack.c.bf16 %v615_v0, %v611_v61 }
 0x11b   :  { %v419_v7 = vpop.f32.mrf.mxu2  ;;  %v508_v9 = vpop.f32.mrf.mxu3 }
 0x11c   :  { %v420_v8 = vadd.f32 %v419_v7, %v1931_v22  ;;  %v244_v12 = vpop.f32.mrf.mxu0  ;;  %v509_v17 = vadd.f32 %v508_v9, %v1934_v25  ;;  %v333_v23 = vpop.f32.mrf.mxu1 }
 0x11d   :  { %v245_v36 = vadd.f32 %v244_v12, %v1911_v10  ;;  %v334_v39 = vadd.f32 %v333_v23, %v1914_v11 }
 0x11e   :  { %v616_v26 = vmax.f32 %v420_v8, 0.0  ;;  %v617_v29 = vmax.f32 %v509_v17, 0.0  ;;  %1011 = vmatmul.bf16.gmra.mxu0 %v1971_v63 }
 0x11f   :  { %1100 = vmatmul.bf16.gmra.mxu1 %v1974_v1  ;;  %v618_v51 = vmax.f32 %v245_v36, 0.0  ;;  %v619_v52 = vmax.f32 %v334_v39, 0.0 }
 0x120   :  { %1189 = vmatmul.bf16.gmra.mxu2 %v1982_v16  ;;  %v2176_v31 = vpack.c.bf16 %v616_v26, %v612_v24  ;;  %1278 = vmatmul.bf16.gmra.mxu3 %v1994_v20  ;;  %v2179_v35 = vpack.c.bf16 %v617_v29, %v613_v27 }
 0x123   :  { %v422_v37 = vpop.f32.mrf.mxu2  ;;  %v511_v41 = vpop.f32.mrf.mxu3 }
 0x124   :  { %v246_v49 = vpop.f32.mrf.mxu0  ;;  %v335_v63 = vpop.f32.mrf.mxu1  ;;  %v423_v20 = vadd.f32 %v422_v37, %v1931_v22  ;;  %v512_v34 = vadd.f32 %v511_v41, %v1934_v25 }
 0x125   :  { %v247_v50 = vadd.f32 %v246_v49, %v1911_v10  ;;  %v336_v1 = vadd.f32 %v335_v63, %v1914_v11 }
 0x126   :  { %v620_v7 = vmax.f32 %v423_v20, 0.0  ;;  %v621_v9 = vmax.f32 %v512_v34, 0.0 }
 0x127   :  { %v622_v16 = vmax.f32 %v247_v50, 0.0  ;;  %v623_v55 = vmax.f32 %v336_v1, 0.0 }
 0x129   :  { %v2185_v56 = vpack.c.bf16 %v622_v16, %v618_v51  ;;  %v2188_v32 = vpack.c.bf16 %v623_v55, %v619_v52 }
 0x12b   :  { %v424_v59 = vpop.f32.mrf.mxu2  ;;  %v513_v61 = vpop.f32.mrf.mxu3 }
 0x12c   :  { %v425_v47 = vadd.f32 %v424_v59, %v1931_v22  ;;  %v249_v0 = vpop.f32.mrf.mxu0  ;;  %v514_v48 = vadd.f32 %v513_v61, %v1934_v25  ;;  %v338_v6 = vpop.f32.mrf.mxu1 }
 0x12d   :  { %v250_v24 = vadd.f32 %v249_v0, %v1911_v10  ;;  %v339_v27 = vadd.f32 %v338_v6, %v1914_v11 }
 0x12e   :  { %v624_v8 = vmax.f32 %v425_v47, 0.0  ;;  %v625_v12 = vmax.f32 %v514_v48, 0.0  ;;  %1016 = vmatmul.bf16.gmra.mxu0 %v2009_v40 }
 0x12f   :  { %1105 = vmatmul.bf16.gmra.mxu1 %v2012_v42  ;;  %v626_v39 = vmax.f32 %v250_v24, 0.0  ;;  %v627_v41 = vmax.f32 %v339_v27, 0.0 }
 0x130   :  { %1194 = vmatmul.bf16.gmra.mxu2 %v2020_v57  ;;  %v2196_v17 = vpack.c.bf16 %v624_v8, %v620_v7  ;;  %1283 = vmatmul.bf16.gmra.mxu3 %v2023_v58  ;;  %v2199_v23 = vpack.c.bf16 %v625_v12, %v621_v9 }
 0x133   :  { %v427_v26 = vpop.f32.mrf.mxu2  ;;  %v516_v29 = vpop.f32.mrf.mxu3 }
 0x134   :  { %v251_v36 = vpop.f32.mrf.mxu0  ;;  %v340_v40 = vpop.f32.mrf.mxu1  ;;  %v428_v58 = vadd.f32 %v427_v26, %v1931_v22  ;;  %v517_v1 = vadd.f32 %v516_v29, %v1934_v25 }
 0x135   :  { %v252_v37 = vadd.f32 %v251_v36, %v1911_v10  ;;  %v341_v42 = vadd.f32 %v340_v40, %v1914_v11 }
 0x136   :  { %v628_v59 = vmax.f32 %v428_v58, 0.0  ;;  %v629_v61 = vmax.f32 %v517_v1, 0.0 }
 0x137   :  { %v630_v57 = vmax.f32 %v252_v37, 0.0  ;;  %v631_v49 = vmax.f32 %v341_v42, 0.0 }
 0x139   :  { %v2205_v50 = vpack.c.bf16 %v630_v57, %v626_v39  ;;  %v2208_v63 = vpack.c.bf16 %v631_v49, %v627_v41 }
 0x13b   :  { %v429_v51 = vpop.f32.mrf.mxu2  ;;  %v518_v52 = vpop.f32.mrf.mxu3 }
 0x13c   :  { %v430_v16 = vadd.f32 %v429_v51, %v1931_v22  ;;  %v254_v55 = vpop.f32.mrf.mxu0  ;;  %v519_v20 = vadd.f32 %v518_v52, %v1934_v25  ;;  %v343_v34 = vpop.f32.mrf.mxu1 }
 0x13d   :  { %v255_v7 = vadd.f32 %v254_v55, %v1911_v10  ;;  %v344_v9 = vadd.f32 %v343_v34, %v1914_v11 }
 0x13e   :  { %v632_v47 = vmax.f32 %v430_v16, 0.0  ;;  %v633_v0 = vmax.f32 %v519_v20, 0.0  ;;  %1021 = vmatmul.bf16.gmra.mxu0 %v2035_v13 }
 0x13f   :  { %1110 = vmatmul.bf16.gmra.mxu1 %v2038_v15  ;;  %v634_v27 = vmax.f32 %v255_v7, 0.0  ;;  %v635_v29 = vmax.f32 %v344_v9, 0.0 }
 0x140   :  { %1199 = vmatmul.bf16.gmra.mxu2 %v2046_v33  ;;  %v2216_v48 = vpack.c.bf16 %v632_v47, %v628_v59  ;;  %1288 = vmatmul.bf16.gmra.mxu3 %v2058_v38  ;;  %v2219_v6 = vpack.c.bf16 %v633_v0, %v629_v61 }
 0x143   :  { %v432_v8 = vpop.f32.mrf.mxu2  ;;  %v521_v12 = vpop.f32.mrf.mxu3 }
 0x144   :  { %v256_v24 = vpop.f32.mrf.mxu0  ;;  %v345_v13 = vpop.f32.mrf.mxu1  ;;  %v433_v38 = vadd.f32 %v432_v8, %v1931_v22  ;;  %v522_v42 = vadd.f32 %v521_v12, %v1934_v25 }
 0x145   :  { %v257_v26 = vadd.f32 %v256_v24, %v1911_v10  ;;  %v346_v15 = vadd.f32 %v345_v13, %v1914_v11 }
 0x146   :  { %v636_v51 = vmax.f32 %v433_v38, 0.0  ;;  %v637_v52 = vmax.f32 %v522_v42, 0.0 }
 0x147   :  { %v638_v33 = vmax.f32 %v257_v26, 0.0  ;;  %v639_v36 = vmax.f32 %v346_v15, 0.0 }
 0x149   :  { %v2225_v37 = vpack.c.bf16 %v638_v33, %v634_v27  ;;  %v2228_v40 = vpack.c.bf16 %v639_v36, %v635_v29 }
 0x14b   :  { %v434_v39 = vpop.f32.mrf.mxu2  ;;  %v523_v41 = vpop.f32.mrf.mxu3 }
 0x14c   :  { %v435_v57 = vadd.f32 %v434_v39, %v1931_v22  ;;  %v259_v49 = vpop.f32.mrf.mxu0  ;;  %v524_v58 = vadd.f32 %v523_v41, %v1934_v25  ;;  %v348_v1 = vpop.f32.mrf.mxu1 }
 0x14d   :  { %v260_v59 = vadd.f32 %v259_v49, %v1911_v10  ;;  %v349_v61 = vadd.f32 %v348_v1, %v1914_v11 }
 0x14e   :  { %v640_v16 = vmax.f32 %v435_v57, 0.0  ;;  %v641_v55 = vmax.f32 %v524_v58, 0.0  ;;  %1026 = vmatmul.bf16.gmra.mxu0 %v2073_v60 }
 0x14f   :  { %1115 = vmatmul.bf16.gmra.mxu1 %v2076_v62  ;;  %v642_v9 = vmax.f32 %v260_v59, 0.0  ;;  %v643_v12 = vmax.f32 %v349_v61, 0.0 }
 0x150   :  { %1204 = vmatmul.bf16.gmra.mxu2 %v2084_v18  ;;  %v2236_v20 = vpack.c.bf16 %v640_v16, %v636_v51  ;;  %1293 = vmatmul.bf16.gmra.mxu3 %v2087_v19  ;;  %v2239_v34 = vpack.c.bf16 %v641_v55, %v637_v52 }
 0x153   :  { %v437_v47 = vpop.f32.mrf.mxu2  ;;  %v526_v0 = vpop.f32.mrf.mxu3 }
 0x154   :  { %v261_v7 = vpop.f32.mrf.mxu0  ;;  %v350_v60 = vpop.f32.mrf.mxu1  ;;  %v438_v19 = vadd.f32 %v437_v47, %v1931_v22  ;;  %v527_v15 = vadd.f32 %v526_v0, %v1934_v25 }
 0x155   :  { %v262_v8 = vadd.f32 %v261_v7, %v1911_v10  ;;  %v351_v62 = vadd.f32 %v350_v60, %v1914_v11 }
 0x156   :  { %v644_v39 = vmax.f32 %v438_v19, 0.0  ;;  %v645_v41 = vmax.f32 %v527_v15, 0.0 }
 0x157   :  { %v646_v18 = vmax.f32 %v262_v8, 0.0  ;;  %v647_v24 = vmax.f32 %v351_v62, 0.0 }
 0x159   :  { %v2245_v26 = vpack.c.bf16 %v646_v18, %v642_v9  ;;  %v2248_v13 = vpack.c.bf16 %v647_v24, %v643_v12 }
 0x15b   :  { %v439_v27 = vpop.f32.mrf.mxu2  ;;  %v528_v29 = vpop.f32.mrf.mxu3 }
 0x15c   :  { %v440_v33 = vadd.f32 %v439_v27, %v1931_v22  ;;  %v264_v36 = vpop.f32.mrf.mxu0  ;;  %v529_v38 = vadd.f32 %v528_v29, %v1934_v25  ;;  %v353_v42 = vpop.f32.mrf.mxu1 }
 0x15d   :  { %v265_v51 = vadd.f32 %v264_v36, %v1911_v10  ;;  %v354_v52 = vadd.f32 %v353_v42, %v1914_v11 }
 0x15e   :  { %v648_v57 = vmax.f32 %v440_v33, 0.0  ;;  %v649_v49 = vmax.f32 %v529_v38, 0.0  ;;  %1031 = vmatmul.bf16.gmra.mxu0 %v2099_v43 }
 0x15f   :  { %1120 = vmatmul.bf16.gmra.mxu1 %v2102_v45  ;;  %v650_v61 = vmax.f32 %v265_v51, 0.0  ;;  %v651_v0 = vmax.f32 %v354_v52, 0.0 }
 0x160   :  { %1209 = vmatmul.bf16.gmra.mxu2 %v2110_v2  ;;  %v2256_v58 = vpack.c.bf16 %v648_v57, %v644_v39  ;;  %1298 = vmatmul.bf16.gmra.mxu3 %v2113_v3  ;;  %v2259_v1 = vpack.c.bf16 %v649_v49, %v645_v41 }
 0x163   :  { %v442_v16 = vpop.f32.mrf.mxu2  ;;  %v531_v55 = vpop.f32.mrf.mxu3 }
 0x164   :  { %v266_v59 = vpop.f32.mrf.mxu0  ;;  %v355_v43 = vpop.f32.mrf.mxu1  ;;  %v443_v3 = vadd.f32 %v442_v16, %v1931_v22  ;;  %v532_v62 = vadd.f32 %v531_v55, %v1934_v25 }
 0x165   :  { %v267_v47 = vadd.f32 %v266_v59, %v1911_v10  ;;  %v356_v45 = vadd.f32 %v355_v43, %v1914_v11 }
 0x166   :  { %v652_v27 = vmax.f32 %v443_v3, 0.0  ;;  %v653_v29 = vmax.f32 %v532_v62, 0.0 }
 0x167   :  { %v654_v2 = vmax.f32 %v267_v47, 0.0  ;;  %v655_v7 = vmax.f32 %v356_v45, 0.0 }
 0x169   :  { %v2265_v8 = vpack.c.bf16 %v654_v2, %v650_v61  ;;  %v2268_v60 = vpack.c.bf16 %v655_v7, %v651_v0 }
 0x16b   :  { %v444_v9 = vpop.f32.mrf.mxu2  ;;  %v533_v12 = vpop.f32.mrf.mxu3 }
 0x16c   :  { %v445_v18 = vadd.f32 %v444_v9, %v1931_v22  ;;  %v269_v24 = vpop.f32.mrf.mxu0  ;;  %v534_v19 = vadd.f32 %v533_v12, %v1934_v25  ;;  %v358_v15 = vpop.f32.mrf.mxu1 }
 0x16d   :  { %v270_v39 = vadd.f32 %v269_v24, %v1911_v10  ;;  %v359_v41 = vadd.f32 %v358_v15, %v1914_v11 }
 0x16e   :  { %v656_v33 = vmax.f32 %v445_v18, 0.0  ;;  %v657_v36 = vmax.f32 %v534_v19, 0.0  ;;  %1036 = vmatmul.bf16.gmra.mxu0 %v2125_v28 }
 0x16f   :  { %1125 = vmatmul.bf16.gmra.mxu1 %v2128_v30  ;;  %v658_v52 = vmax.f32 %v270_v39, 0.0  ;;  %v659_v55 = vmax.f32 %v359_v41, 0.0 }
 0x170   :  { %1214 = vmatmul.bf16.gmra.mxu2 %v2136_v53  ;;  %v2276_v38 = vpack.c.bf16 %v656_v33, %v652_v27  ;;  %1303 = vmatmul.bf16.gmra.mxu3 %v2139_v54  ;;  %v2279_v42 = vpack.c.bf16 %v657_v36, %v653_v29 }
 0x173   :  { %v447_v57 = vpop.f32.mrf.mxu2  ;;  %v536_v49 = vpop.f32.mrf.mxu3 }
 0x174   :  { %v271_v51 = vpop.f32.mrf.mxu0  ;;  %v360_v28 = vpop.f32.mrf.mxu1  ;;  %v448_v54 = vadd.f32 %v447_v57, %v1931_v22  ;;  %v537_v45 = vadd.f32 %v536_v49, %v1934_v25 }
 0x175   :  { %v272_v16 = vadd.f32 %v271_v51, %v1911_v10  ;;  %v361_v30 = vadd.f32 %v360_v28, %v1914_v11  ;;  %v2311_v28 = vld [vmem:[%s2486_s4] ss:$0 sm:$0xff] }
 0x176   :  { %v660_v9 = vmax.f32 %v448_v54, 0.0  ;;  %v661_v12 = vmax.f32 %v537_v45, 0.0 }
 0x177   :  { %v662_v53 = vmax.f32 %v272_v16, 0.0  ;;  %v663_v59 = vmax.f32 %v361_v30, 0.0 }
 0x179   :  { %v2285_v47 = vpack.c.bf16 %v662_v53, %v658_v52  ;;  %v2288_v43 = vpack.c.bf16 %v663_v59, %v659_v55 }
 0x17b   :  { %v449_v61 = vpop.f32.mrf.mxu2  ;;  %v538_v0 = vpop.f32.mrf.mxu3 }
 0x17c   :  { %v450_v2 = vadd.f32 %v449_v61, %v1931_v22  ;;  %v274_v7 = vpop.f32.mrf.mxu0  ;;  %v539_v3 = vadd.f32 %v538_v0, %v1934_v25  ;;  %v363_v62 = vpop.f32.mrf.mxu1 }
 0x17d   :  { %v275_v27 = vadd.f32 %v274_v7, %v1911_v10  ;;  %v364_v29 = vadd.f32 %v363_v62, %v1914_v11 }
 0x17e   :  { %v664_v18 = vmax.f32 %v450_v2, 0.0  ;;  %v665_v24 = vmax.f32 %v539_v3, 0.0  ;;  %1041 = vmatmul.bf16.gmra.mxu0 %v2145_v14 }
 0x17f   :  { %1130 = vmatmul.bf16.gmra.mxu1 %v2148_v21  ;;  %v666_v41 = vmax.f32 %v275_v27, 0.0  ;;  %v667_v49 = vmax.f32 %v364_v29, 0.0 }
 0x180   :  { %1219 = vmatmul.bf16.gmra.mxu2 %v2156_v44  ;;  %v2296_v19 = vpack.c.bf16 %v664_v18, %v660_v9  ;;  %1308 = vmatmul.bf16.gmra.mxu3 %v2159_v46  ;;  %v2299_v15 = vpack.c.bf16 %v665_v24, %v661_v12 }
 0x183   :  { %v452_v33 = vpop.f32.mrf.mxu2  ;;  %v541_v36 = vpop.f32.mrf.mxu3 }
 0x184   :  { %v276_v39 = vpop.f32.mrf.mxu0  ;;  %v365_v14 = vpop.f32.mrf.mxu1  ;;  %v453_v46 = vadd.f32 %v452_v33, %v1931_v22 }
 0x185   :  { %v277_v57 = vadd.f32 %v276_v39, %v1911_v10  ;;  %v366_v21 = vadd.f32 %v365_v14, %v1914_v11  ;;  %v542_v10 = vadd.f32 %v541_v36, %v1934_v25 }
 0x186   :  { %v668_v45 = vmax.f32 %v453_v46, 0.0 }
 0x187   :  { %v670_v44 = vmax.f32 %v277_v57, 0.0  ;;  %v671_v51 = vmax.f32 %v366_v21, 0.0  ;;  %v669_v0 = vmax.f32 %v542_v10, 0.0 }
 0x189   :  { %v2305_v16 = vpack.c.bf16 %v670_v44, %v666_v41  ;;  %v2313_v30 = vpack.c.bf16 %v671_v51, %v667_v49 }
 0x18b   :  { %v454_v52 = vpop.f32.mrf.mxu2  ;;  %v543_v53 = vpop.f32.mrf.mxu3 }
 0x18c   :  { %v455_v11 = vadd.f32 %v454_v52, %v1931_v22  ;;  %v1007_v55 = vpop.f32.mrf.mxu0  ;;  %v544_v59 = vadd.f32 %v543_v53, %v1934_v25  ;;  %v1096_v54 = vpop.f32.mrf.mxu1 }
 0x18d   :  { %v1008_v2 = vadd.f32 %v2311_v28, %v1007_v55 }
 0x18e   :  { %v672_v61 = vmax.f32 %v455_v11, 0.0  ;;  %v673_v7 = vmax.f32 %v544_v59, 0.0  ;;  %1046 = vmatmul.bf16.gmra.mxu0 %v2165_v4 }
 0x18f   :  { %1135 = vmatmul.bf16.gmra.mxu1 %v2168_v5  ;;  %v1097_v25 = vadd.f32 %v1096_v54, %v1008_v2 }
 0x190   :  { %1224 = vmatmul.bf16.gmra.mxu2 %v2176_v31  ;;  %v2322_v3 = vpack.c.bf16 %v672_v61, %v668_v45  ;;  %1313 = vmatmul.bf16.gmra.mxu3 %v2179_v35  ;;  %v2325_v22 = vpack.c.bf16 %v673_v7, %v669_v0 }
 0x193   :  { %v1185_v62 = vpop.f32.mrf.mxu2  ;;  %v1274_v18 = vpop.f32.mrf.mxu3 }
 0x194   :  { %v1186_v9 = vadd.f32 %v1185_v62, %v1097_v25  ;;  %v1009_v12 = vpop.f32.mrf.mxu0  ;;  %v1098_v24 = vpop.f32.mrf.mxu1 }
 0x195   :  { %v1010_v33 = vadd.f32 %v2311_v28, %v1009_v12 }
 0x196   :  { %v1275_v27 = vadd.f32 %v1274_v18, %v1186_v9 }
 0x197   :  { %v1099_v4 = vadd.f32 %v1098_v24, %v1010_v33 }
 0x198   :  { %1354 = vst [vmem:[%s2487_s5] sm:$0xff] %v1275_v27 }
 0x19b   :  { %v1187_v5 = vpop.f32.mrf.mxu2  ;;  %v1276_v29 = vpop.f32.mrf.mxu3 }
 0x19c   :  { %v1188_v31 = vadd.f32 %v1187_v5, %v1099_v4  ;;  %v1012_v35 = vpop.f32.mrf.mxu0  ;;  %v1101_v36 = vpop.f32.mrf.mxu1 }
 0x19d   :  { %v1013_v57 = vadd.f32 %v2311_v28, %v1012_v35 }
 0x19e   :  { %v1277_v39 = vadd.f32 %v1276_v29, %v1188_v31  ;;  %1051 = vmatmul.bf16.gmra.mxu0 %v2185_v56 }
 0x19f   :  { %1140 = vmatmul.bf16.gmra.mxu1 %v2188_v32  ;;  %v1102_v14 = vadd.f32 %v1101_v36, %v1013_v57 }
 0x1a0   :  { %1355 = vst [vmem:[%s2487_s5 + $0x8] sm:$0xff] %v1277_v39  ;;  %1229 = vmatmul.bf16.gmra.mxu2 %v2196_v17  ;;  %1318 = vmatmul.bf16.gmra.mxu3 %v2199_v23 }
 0x1a3   :  { %v1190_v21 = vpop.f32.mrf.mxu2  ;;  %v1279_v44 = vpop.f32.mrf.mxu3 }
 0x1a4   :  { %v1191_v41 = vadd.f32 %v1190_v21, %v1102_v14  ;;  %v1014_v49 = vpop.f32.mrf.mxu0  ;;  %v1103_v51 = vpop.f32.mrf.mxu1 }
 0x1a5   :  { %v1015_v10 = vadd.f32 %v2311_v28, %v1014_v49 }
 0x1a6   :  { %v1280_v46 = vadd.f32 %v1279_v44, %v1191_v41 }
 0x1a7   :  { %v1104_v56 = vadd.f32 %v1103_v51, %v1015_v10 }
 0x1a8   :  { %1356 = vst [vmem:[%s2487_s5 + $0x10] sm:$0xff] %v1280_v46 }
 0x1ab   :  { %v1192_v52 = vpop.f32.mrf.mxu2  ;;  %v1281_v11 = vpop.f32.mrf.mxu3 }
 0x1ac   :  { %v1193_v32 = vadd.f32 %v1192_v52, %v1104_v56  ;;  %v1017_v17 = vpop.f32.mrf.mxu0  ;;  %v1106_v53 = vpop.f32.mrf.mxu1 }
 0x1ad   :  { %v1018_v55 = vadd.f32 %v2311_v28, %v1017_v17 }
 0x1ae   :  { %v1282_v23 = vadd.f32 %v1281_v11, %v1193_v32  ;;  %1056 = vmatmul.bf16.gmra.mxu0 %v2205_v50 }
 0x1af   :  { %1145 = vmatmul.bf16.gmra.mxu1 %v2208_v63  ;;  %v1107_v59 = vadd.f32 %v1106_v53, %v1018_v55 }
 0x1b0   :  { %1357 = vst [vmem:[%s2487_s5 + $0x18] sm:$0xff] %v1282_v23  ;;  %1234 = vmatmul.bf16.gmra.mxu2 %v2216_v48  ;;  %1323 = vmatmul.bf16.gmra.mxu3 %v2219_v6 }
 0x1b3   :  { %v1195_v54 = vpop.f32.mrf.mxu2  ;;  %v1284_v61 = vpop.f32.mrf.mxu3 }
 0x1b4   :  { %v1196_v45 = vadd.f32 %v1195_v54, %v1107_v59  ;;  %v1019_v2 = vpop.f32.mrf.mxu0  ;;  %v1108_v0 = vpop.f32.mrf.mxu1 }
 0x1b5   :  { %v1020_v25 = vadd.f32 %v2311_v28, %v1019_v2 }
 0x1b6   :  { %v1285_v7 = vadd.f32 %v1284_v61, %v1196_v45 }
 0x1b7   :  { %v1109_v50 = vadd.f32 %v1108_v0, %v1020_v25 }
 0x1b8   :  { %1358 = vst [vmem:[%s2487_s5 + $0x20] sm:$0xff] %v1285_v7 }
 0x1bb   :  { %v1197_v62 = vpop.f32.mrf.mxu2  ;;  %v1286_v9 = vpop.f32.mrf.mxu3 }
 0x1bc   :  { %v1198_v63 = vadd.f32 %v1197_v62, %v1109_v50  ;;  %v1022_v48 = vpop.f32.mrf.mxu0  ;;  %v1111_v18 = vpop.f32.mrf.mxu1 }
 0x1bd   :  { %v1023_v12 = vadd.f32 %v2311_v28, %v1022_v48 }
 0x1be   :  { %v1287_v6 = vadd.f32 %v1286_v9, %v1198_v63  ;;  %1061 = vmatmul.bf16.gmra.mxu0 %v2225_v37 }
 0x1bf   :  { %1150 = vmatmul.bf16.gmra.mxu1 %v2228_v40  ;;  %v1112_v24 = vadd.f32 %v1111_v18, %v1023_v12 }
 0x1c0   :  { %1359 = vst [vmem:[%s2487_s5 + $0x28] sm:$0xff] %v1287_v6  ;;  %1239 = vmatmul.bf16.gmra.mxu2 %v2236_v20  ;;  %1328 = vmatmul.bf16.gmra.mxu3 %v2239_v34 }
 0x1c3   :  { %v1200_v27 = vpop.f32.mrf.mxu2  ;;  %v1289_v4 = vpop.f32.mrf.mxu3 }
 0x1c4   :  { %v1201_v33 = vadd.f32 %v1200_v27, %v1112_v24  ;;  %v1024_v5 = vpop.f32.mrf.mxu0  ;;  %v1113_v31 = vpop.f32.mrf.mxu1 }
 0x1c5   :  { %v1025_v35 = vadd.f32 %v2311_v28, %v1024_v5 }
 0x1c6   :  { %v1290_v29 = vadd.f32 %v1289_v4, %v1201_v33 }
 0x1c7   :  { %v1114_v37 = vadd.f32 %v1113_v31, %v1025_v35 }
 0x1c8   :  { %1360 = vst [vmem:[%s2487_s5 + $0x30] sm:$0xff] %v1290_v29 }
 0x1cb   :  { %v1202_v36 = vpop.f32.mrf.mxu2  ;;  %v1291_v39 = vpop.f32.mrf.mxu3 }
 0x1cc   :  { %v1203_v40 = vadd.f32 %v1202_v36, %v1114_v37  ;;  %v1027_v20 = vpop.f32.mrf.mxu0  ;;  %v1116_v57 = vpop.f32.mrf.mxu1 }
 0x1cd   :  { %v1028_v14 = vadd.f32 %v2311_v28, %v1027_v20 }
 0x1ce   :  { %v1292_v34 = vadd.f32 %v1291_v39, %v1203_v40  ;;  %1066 = vmatmul.bf16.gmra.mxu0 %v2245_v26 }
 0x1cf   :  { %1155 = vmatmul.bf16.gmra.mxu1 %v2248_v13  ;;  %v1117_v21 = vadd.f32 %v1116_v57, %v1028_v14 }
 0x1d0   :  { %1361 = vst [vmem:[%s2487_s5 + $0x38] sm:$0xff] %v1292_v34  ;;  %1244 = vmatmul.bf16.gmra.mxu2 %v2256_v58  ;;  %1333 = vmatmul.bf16.gmra.mxu3 %v2259_v1 }
 0x1d3   :  { %v1205_v41 = vpop.f32.mrf.mxu2  ;;  %v1294_v49 = vpop.f32.mrf.mxu3 }
 0x1d4   :  { %v1206_v44 = vadd.f32 %v1205_v41, %v1117_v21  ;;  %v1029_v51 = vpop.f32.mrf.mxu0  ;;  %v1118_v46 = vpop.f32.mrf.mxu1 }
 0x1d5   :  { %v1030_v56 = vadd.f32 %v2311_v28, %v1029_v51 }
 0x1d6   :  { %v1295_v10 = vadd.f32 %v1294_v49, %v1206_v44 }
 0x1d7   :  { %v1119_v26 = vadd.f32 %v1118_v46, %v1030_v56 }
 0x1d8   :  { %1362 = vst [vmem:[%s2487_s5 + $0x40] sm:$0xff] %v1295_v10 }
 0x1db   :  { %v1207_v52 = vpop.f32.mrf.mxu2  ;;  %v1296_v32 = vpop.f32.mrf.mxu3 }
 0x1dc   :  { %v1208_v13 = vadd.f32 %v1207_v52, %v1119_v26  ;;  %v1032_v58 = vpop.f32.mrf.mxu0  ;;  %v1121_v11 = vpop.f32.mrf.mxu1 }
 0x1dd   :  { %v1033_v17 = vadd.f32 %v2311_v28, %v1032_v58 }
 0x1de   :  { %v1297_v1 = vadd.f32 %v1296_v32, %v1208_v13  ;;  %1071 = vmatmul.bf16.gmra.mxu0 %v2265_v8 }
 0x1df   :  { %1160 = vmatmul.bf16.gmra.mxu1 %v2268_v60  ;;  %v1122_v53 = vadd.f32 %v1121_v11, %v1033_v17 }
 0x1e0   :  { %1363 = vst [vmem:[%s2487_s5 + $0x48] sm:$0xff] %v1297_v1  ;;  %1249 = vmatmul.bf16.gmra.mxu2 %v2276_v38  ;;  %1338 = vmatmul.bf16.gmra.mxu3 %v2279_v42 }
 0x1e3   :  { %v1210_v23 = vpop.f32.mrf.mxu2  ;;  %v1299_v59 = vpop.f32.mrf.mxu3 }
 0x1e4   :  { %v1211_v55 = vadd.f32 %v1210_v23, %v1122_v53  ;;  %v1034_v54 = vpop.f32.mrf.mxu0  ;;  %v1123_v45 = vpop.f32.mrf.mxu1 }
 0x1e5   :  { %v1035_v2 = vadd.f32 %v2311_v28, %v1034_v54 }
 0x1e6   :  { %v1300_v61 = vadd.f32 %v1299_v59, %v1211_v55 }
 0x1e7   :  { %v1124_v8 = vadd.f32 %v1123_v45, %v1035_v2 }
 0x1e8   :  { %1364 = vst [vmem:[%s2487_s5 + $0x50] sm:$0xff] %v1300_v61 }
 0x1eb   :  { %v1212_v0 = vpop.f32.mrf.mxu2  ;;  %v1301_v7 = vpop.f32.mrf.mxu3 }
 0x1ec   :  { %v1213_v60 = vadd.f32 %v1212_v0, %v1124_v8  ;;  %v1037_v38 = vpop.f32.mrf.mxu0  ;;  %v1126_v25 = vpop.f32.mrf.mxu1 }
 0x1ed   :  { %v1038_v50 = vadd.f32 %v2311_v28, %v1037_v38 }
 0x1ee   :  { %v1302_v42 = vadd.f32 %v1301_v7, %v1213_v60  ;;  %1076 = vmatmul.bf16.gmra.mxu0 %v2285_v47 }
 0x1ef   :  { %1165 = vmatmul.bf16.gmra.mxu1 %v2288_v43  ;;  %v1127_v62 = vadd.f32 %v1126_v25, %v1038_v50 }
 0x1f0   :  { %1365 = vst [vmem:[%s2487_s5 + $0x58] sm:$0xff] %v1302_v42  ;;  %1254 = vmatmul.bf16.gmra.mxu2 %v2296_v19  ;;  %1343 = vmatmul.bf16.gmra.mxu3 %v2299_v15 }
 0x1f3   :  { %v1215_v63 = vpop.f32.mrf.mxu2  ;;  %v1304_v48 = vpop.f32.mrf.mxu3 }
 0x1f4   :  { %v1216_v9 = vadd.f32 %v1215_v63, %v1127_v62  ;;  %v1039_v18 = vpop.f32.mrf.mxu0  ;;  %v1128_v6 = vpop.f32.mrf.mxu1 }
 0x1f5   :  { %v1040_v24 = vadd.f32 %v2311_v28, %v1039_v18 }
 0x1f6   :  { %v1305_v12 = vadd.f32 %v1304_v48, %v1216_v9 }
 0x1f7   :  { %v1129_v47 = vadd.f32 %v1128_v6, %v1040_v24 }
 0x1f8   :  { %1366 = vst [vmem:[%s2487_s5 + $0x60] sm:$0xff] %v1305_v12 }
 0x1fb   :  { %v1217_v27 = vpop.f32.mrf.mxu2  ;;  %v1306_v33 = vpop.f32.mrf.mxu3 }
 0x1fc   :  { %v1218_v43 = vadd.f32 %v1217_v27, %v1129_v47  ;;  %v1042_v19 = vpop.f32.mrf.mxu0  ;;  %v1131_v4 = vpop.f32.mrf.mxu1 }
 0x1fd   :  { %v1043_v5 = vadd.f32 %v2311_v28, %v1042_v19 }
 0x1fe   :  { %v1307_v15 = vadd.f32 %v1306_v33, %v1218_v43  ;;  %1081 = vmatmul.bf16.gmra.mxu0 %v2305_v16 }
 0x1ff   :  { %1170 = vmatmul.bf16.gmra.mxu1 %v2313_v30  ;;  %v1132_v31 = vadd.f32 %v1131_v4, %v1043_v5 }
 0x200   :  { %1367 = vst [vmem:[%s2487_s5 + $0x68] sm:$0xff] %v1307_v15  ;;  %1259 = vmatmul.bf16.gmra.mxu2 %v2322_v3  ;;  %1348 = vmatmul.bf16.gmra.mxu3 %v2325_v22 }
 0x203   :  { %v1220_v29 = vpop.f32.mrf.mxu2  ;;  %v1309_v37 = vpop.f32.mrf.mxu3 }
 0x204   :  { %v1221_v35 = vadd.f32 %v1220_v29, %v1132_v31  ;;  %v1044_v36 = vpop.f32.mrf.mxu0  ;;  %v1133_v40 = vpop.f32.mrf.mxu1 }
 0x205   :  { %v1045_v20 = vadd.f32 %v2311_v28, %v1044_v36 }
 0x206   :  { %v1310_v39 = vadd.f32 %v1309_v37, %v1221_v35 }
 0x207   :  { %v1134_v16 = vadd.f32 %v1133_v40, %v1045_v20 }
 0x208   :  { %1368 = vst [vmem:[%s2487_s5 + $0x70] sm:$0xff] %v1310_v39 }
 0x20b   :  { %v1222_v57 = vpop.f32.mrf.mxu2  ;;  %v1311_v34 = vpop.f32.mrf.mxu3 }
 0x20c   :  { %v1223_v30 = vadd.f32 %v1222_v57, %v1134_v16  ;;  %v1047_v3 = vpop.f32.mrf.mxu0  ;;  %v1136_v14 = vpop.f32.mrf.mxu1 }
 0x20d   :  { %v1048_v21 = vadd.f32 %v2311_v28, %v1047_v3 }
 0x20e   :  { %v1312_v22 = vadd.f32 %v1311_v34, %v1223_v30 }
 0x20f   :  { %v1137_v41 = vadd.f32 %v1136_v14, %v1048_v21 }
 0x210   :  { %1369 = vst [vmem:[%s2487_s5 + $0x78] sm:$0xff] %v1312_v22 }
 0x213   :  { %v1225_v44 = vpop.f32.mrf.mxu2  ;;  %v1314_v51 = vpop.f32.mrf.mxu3 }
 0x214   :  { %v1226_v49 = vadd.f32 %v1225_v44, %v1137_v41  ;;  %v1049_v46 = vpop.f32.mrf.mxu0  ;;  %v1138_v10 = vpop.f32.mrf.mxu1 }
 0x215   :  { %v1050_v26 = vadd.f32 %v2311_v28, %v1049_v46 }
 0x216   :  { %v1315_v56 = vadd.f32 %v1314_v51, %v1226_v49 }
 0x217   :  { %v1139_v52 = vadd.f32 %v1138_v10, %v1050_v26 }
 0x218   :  { %1370 = vst [vmem:[%s2487_s5 + $0x80] sm:$0xff] %v1315_v56 }
 0x21b   :  { %v1227_v13 = vpop.f32.mrf.mxu2  ;;  %v1316_v58 = vpop.f32.mrf.mxu3 }
 0x21c   :  { %v1228_v32 = vadd.f32 %v1227_v13, %v1139_v52  ;;  %v1052_v11 = vpop.f32.mrf.mxu0  ;;  %v1141_v1 = vpop.f32.mrf.mxu1 }
 0x21d   :  { %v1053_v53 = vadd.f32 %v2311_v28, %v1052_v11 }
 0x21e   :  { %v1317_v17 = vadd.f32 %v1316_v58, %v1228_v32 }
 0x21f   :  { %v1142_v23 = vadd.f32 %v1141_v1, %v1053_v53 }
 0x220   :  { %1371 = vst [vmem:[%s2487_s5 + $0x88] sm:$0xff] %v1317_v17 }
 0x223   :  { %v1230_v55 = vpop.f32.mrf.mxu2  ;;  %v1319_v54 = vpop.f32.mrf.mxu3 }
 0x224   :  { %v1231_v59 = vadd.f32 %v1230_v55, %v1142_v23  ;;  %v1054_v45 = vpop.f32.mrf.mxu0  ;;  %v1143_v61 = vpop.f32.mrf.mxu1 }
 0x225   :  { %v1055_v8 = vadd.f32 %v2311_v28, %v1054_v45 }
 0x226   :  { %v1320_v2 = vadd.f32 %v1319_v54, %v1231_v59 }
 0x227   :  { %v1144_v0 = vadd.f32 %v1143_v61, %v1055_v8 }
 0x228   :  { %1372 = vst [vmem:[%s2487_s5 + $0x90] sm:$0xff] %v1320_v2 }
 0x22b   :  { %v1232_v60 = vpop.f32.mrf.mxu2  ;;  %v1321_v38 = vpop.f32.mrf.mxu3 }
 0x22c   :  { %v1233_v7 = vadd.f32 %v1232_v60, %v1144_v0  ;;  %v1057_v25 = vpop.f32.mrf.mxu0  ;;  %v1146_v42 = vpop.f32.mrf.mxu1 }
 0x22d   :  { %v1058_v62 = vadd.f32 %v2311_v28, %v1057_v25 }
 0x22e   :  { %v1322_v50 = vadd.f32 %v1321_v38, %v1233_v7 }
 0x22f   :  { %v1147_v63 = vadd.f32 %v1146_v42, %v1058_v62 }
 0x230   :  { %1373 = vst [vmem:[%s2487_s5 + $0x98] sm:$0xff] %v1322_v50 }
 0x233   :  { %v1235_v9 = vpop.f32.mrf.mxu2  ;;  %v1324_v18 = vpop.f32.mrf.mxu3 }
 0x234   :  { %v1236_v48 = vadd.f32 %v1235_v9, %v1147_v63  ;;  %v1059_v6 = vpop.f32.mrf.mxu0  ;;  %v1148_v12 = vpop.f32.mrf.mxu1 }
 0x235   :  { %v1060_v47 = vadd.f32 %v2311_v28, %v1059_v6 }
 0x236   :  { %v1325_v24 = vadd.f32 %v1324_v18, %v1236_v48 }
 0x237   :  { %v1149_v27 = vadd.f32 %v1148_v12, %v1060_v47 }
 0x238   :  { %1374 = vst [vmem:[%s2487_s5 + $0xa0] sm:$0xff] %v1325_v24 }
 0x23b   :  { %v1237_v43 = vpop.f32.mrf.mxu2  ;;  %v1326_v19 = vpop.f32.mrf.mxu3 }
 0x23c   :  { %v1238_v33 = vadd.f32 %v1237_v43, %v1149_v27  ;;  %v1062_v4 = vpop.f32.mrf.mxu0  ;;  %v1151_v15 = vpop.f32.mrf.mxu1 }
 0x23d   :  { %v1063_v31 = vadd.f32 %v2311_v28, %v1062_v4 }
 0x23e   :  { %v1327_v5 = vadd.f32 %v1326_v19, %v1238_v33 }
 0x23f   :  { %v1152_v29 = vadd.f32 %v1151_v15, %v1063_v31 }
 0x240   :  { %1375 = vst [vmem:[%s2487_s5 + $0xa8] sm:$0xff] %v1327_v5 }
 0x243   :  { %v1240_v35 = vpop.f32.mrf.mxu2  ;;  %v1329_v36 = vpop.f32.mrf.mxu3 }
 0x244   :  { %v1241_v37 = vadd.f32 %v1240_v35, %v1152_v29  ;;  %v1064_v40 = vpop.f32.mrf.mxu0  ;;  %v1153_v39 = vpop.f32.mrf.mxu1 }
 0x245   :  { %v1065_v16 = vadd.f32 %v2311_v28, %v1064_v40 }
 0x246   :  { %v1330_v20 = vadd.f32 %v1329_v36, %v1241_v37 }
 0x247   :  { %v1154_v57 = vadd.f32 %v1153_v39, %v1065_v16 }
 0x248   :  { %1376 = vst [vmem:[%s2487_s5 + $0xb0] sm:$0xff] %v1330_v20 }
 0x24b   :  { %v1242_v30 = vpop.f32.mrf.mxu2  ;;  %v1331_v3 = vpop.f32.mrf.mxu3 }
 0x24c   :  { %v1243_v34 = vadd.f32 %v1242_v30, %v1154_v57  ;;  %v1067_v14 = vpop.f32.mrf.mxu0  ;;  %v1156_v22 = vpop.f32.mrf.mxu1 }
 0x24d   :  { %v1068_v41 = vadd.f32 %v2311_v28, %v1067_v14 }
 0x24e   :  { %v1332_v21 = vadd.f32 %v1331_v3, %v1243_v34 }
 0x24f   :  { %v1157_v44 = vadd.f32 %v1156_v22, %v1068_v41 }
 0x250   :  { %1377 = vst [vmem:[%s2487_s5 + $0xb8] sm:$0xff] %v1332_v21 }
 0x253   :  { %v1245_v49 = vpop.f32.mrf.mxu2  ;;  %v1334_v46 = vpop.f32.mrf.mxu3 }
 0x254   :  { %v1246_v51 = vadd.f32 %v1245_v49, %v1157_v44  ;;  %v1069_v10 = vpop.f32.mrf.mxu0  ;;  %v1158_v56 = vpop.f32.mrf.mxu1 }
 0x255   :  { %v1070_v52 = vadd.f32 %v2311_v28, %v1069_v10 }
 0x256   :  { %v1335_v26 = vadd.f32 %v1334_v46, %v1246_v51 }
 0x257   :  { %v1159_v13 = vadd.f32 %v1158_v56, %v1070_v52 }
 0x258   :  { %1378 = vst [vmem:[%s2487_s5 + $0xc0] sm:$0xff] %v1335_v26 }
 0x25b   :  { %v1247_v32 = vpop.f32.mrf.mxu2  ;;  %v1336_v11 = vpop.f32.mrf.mxu3 }
 0x25c   :  { %v1248_v58 = vadd.f32 %v1247_v32, %v1159_v13  ;;  %v1072_v1 = vpop.f32.mrf.mxu0  ;;  %v1161_v17 = vpop.f32.mrf.mxu1 }
 0x25d   :  { %v1073_v23 = vadd.f32 %v2311_v28, %v1072_v1 }
 0x25e   :  { %v1337_v53 = vadd.f32 %v1336_v11, %v1248_v58 }
 0x25f   :  { %v1162_v55 = vadd.f32 %v1161_v17, %v1073_v23 }
 0x260   :  { %1379 = vst [vmem:[%s2487_s5 + $0xc8] sm:$0xff] %v1337_v53 }
 0x263   :  { %v1250_v59 = vpop.f32.mrf.mxu2  ;;  %v1339_v45 = vpop.f32.mrf.mxu3 }
 0x264   :  { %v1251_v54 = vadd.f32 %v1250_v59, %v1162_v55  ;;  %v1074_v61 = vpop.f32.mrf.mxu0  ;;  %v1163_v2 = vpop.f32.mrf.mxu1 }
 0x265   :  { %v1075_v0 = vadd.f32 %v2311_v28, %v1074_v61 }
 0x266   :  { %v1340_v8 = vadd.f32 %v1339_v45, %v1251_v54 }
 0x267   :  { %v1164_v60 = vadd.f32 %v1163_v2, %v1075_v0 }
 0x268   :  { %1380 = vst [vmem:[%s2487_s5 + $0xd0] sm:$0xff] %v1340_v8 }
 0x26b   :  { %v1252_v7 = vpop.f32.mrf.mxu2  ;;  %v1341_v25 = vpop.f32.mrf.mxu3 }
 0x26c   :  { %v1253_v38 = vadd.f32 %v1252_v7, %v1164_v60  ;;  %v1077_v42 = vpop.f32.mrf.mxu0  ;;  %v1166_v50 = vpop.f32.mrf.mxu1 }
 0x26d   :  { %v1078_v63 = vadd.f32 %v2311_v28, %v1077_v42 }
 0x26e   :  { %v1342_v62 = vadd.f32 %v1341_v25, %v1253_v38 }
 0x26f   :  { %v1167_v9 = vadd.f32 %v1166_v50, %v1078_v63 }
 0x270   :  { %1381 = vst [vmem:[%s2487_s5 + $0xd8] sm:$0xff] %v1342_v62 }
 0x273   :  { %v1255_v48 = vpop.f32.mrf.mxu2  ;;  %v1344_v6 = vpop.f32.mrf.mxu3 }
 0x274   :  { %v1256_v18 = vadd.f32 %v1255_v48, %v1167_v9  ;;  %v1079_v12 = vpop.f32.mrf.mxu0  ;;  %v1168_v24 = vpop.f32.mrf.mxu1 }
 0x275   :  { %v1080_v27 = vadd.f32 %v2311_v28, %v1079_v12 }
 0x276   :  { %v1345_v47 = vadd.f32 %v1344_v6, %v1256_v18 }
 0x277   :  { %v1169_v43 = vadd.f32 %v1168_v24, %v1080_v27 }
 0x278   :  { %1382 = vst [vmem:[%s2487_s5 + $0xe0] sm:$0xff] %v1345_v47 }
 0x27b   :  { %v1257_v33 = vpop.f32.mrf.mxu2  ;;  %v1346_v4 = vpop.f32.mrf.mxu3 }
 0x27c   :  { %v1258_v19 = vadd.f32 %v1257_v33, %v1169_v43  ;;  %v1082_v15 = vpop.f32.mrf.mxu0  ;;  %v1171_v29 = vpop.f32.mrf.mxu1 }
 0x27d   :  { %v1083_v31 = vadd.f32 %v2311_v28, %v1082_v15 }
 0x27e   :  { %v1347_v5 = vadd.f32 %v1346_v4, %v1258_v19 }
 0x27f   :  { %v1172_v35 = vadd.f32 %v1171_v29, %v1083_v31 }
 0x280   :  { %1383 = vst [vmem:[%s2487_s5 + $0xe8] sm:$0xff] %v1347_v5 }
 0x283   :  { %v1260_v37 = vpop.f32.mrf.mxu2  ;;  %v1349_v40 = vpop.f32.mrf.mxu3 }
 0x284   :  { %v1261_v36 = vadd.f32 %v1260_v37, %v1172_v35  ;;  %v1084_v39 = vpop.f32.mrf.mxu0  ;;  %v1173_v57 = vpop.f32.mrf.mxu1 }
 0x285   :  { %v1085_v16 = vadd.f32 %v2311_v28, %v1084_v39 }
 0x286   :  { %v1350_v20 = vadd.f32 %v1349_v40, %v1261_v36 }
 0x287   :  { %v1174_v30 = vadd.f32 %v1173_v57, %v1085_v16 }
 0x288   :  { %1384 = vst [vmem:[%s2487_s5 + $0xf0] sm:$0xff] %v1350_v20 }
 0x28b   :  { %v1262_v34 = vpop.f32.mrf.mxu2  ;;  %v1351_v14 = vpop.f32.mrf.mxu3 }
 0x28c   :  { %v1263_v3 = vadd.f32 %v1262_v34, %v1174_v30 }
 0x28e   :  { %v1352_v22 = vadd.f32 %v1351_v14, %v1263_v3 }
 0x290   :  { %1385 = vst [vmem:[%s2487_s5 + $0xf8] sm:$0xff] %v1352_v22 }
 0x291   :  { %1390 = vsyncpa [#allocation3], 1 }

</bundles_post_ra>
